<compile_context>
chip_gen: v7x
topology: tpu7x:2x2x1
jax: 0.10.0
libtpu: 0.0.40
codegen_flags: <defaults>
</compile_context>

<pallas_src>
import functools
import math

import jax
import jax.numpy as jnp
import numpy as np
from jax.experimental import pallas as pl
from jax.experimental.pallas import tpu as pltpu


# ------------------------------------------------------------------ kernel helpers


def _attend(qb, kb, vb):
    """One (n, f) head-batch attention; bf16 MXU operands, f32 accumulation."""
    s = jax.lax.dot_general(
        qb.astype(jnp.bfloat16), kb.astype(jnp.bfloat16),
        dimension_numbers=(((1,), (1,)), ((), ())),       # contract last axes: no k.T
        preferred_element_type=jnp.float32)                # (n, n)
    s = s - jnp.max(s, axis=-1, keepdims=True)
    p = jnp.exp(s)
    denom = jnp.sum(p, axis=-1, keepdims=True)
    o = jnp.dot(p.astype(jnp.bfloat16), vb.astype(jnp.bfloat16),
                preferred_element_type=jnp.float32)        # (n, f)
    # Scale the (n, f) output instead of the (n, n) prob matrix; EUP approx reciprocal.
    return o * pl.reciprocal(denom, approx=True)


def mhsa_blockdiag_kernel(x_ref, wq_ref, bq_ref, wk_ref, bk_ref, wv_ref, bv_ref,
                          wo_ref, bo_ref, o_ref,
                          q_scr, k_scr, v_scr, a_scr, *, bb, n, h, f):
    """f_per_head < 128: block-diagonal (feats, feats) weights, fused-head matmuls."""
    x = x_ref[...].astype(jnp.bfloat16)                    # (bb*n, feats) lane-dense

    # Fused lane-dense q/k/v projections; 1/sqrt(feats) already folded into wq/bq.
    q_scr[...] = (jnp.dot(x, wq_ref[...], preferred_element_type=jnp.float32)
                  + bq_ref[...]).astype(jnp.bfloat16)
    k_scr[...] = (jnp.dot(x, wk_ref[...], preferred_element_type=jnp.float32)
                  + bk_ref[...]).astype(jnp.bfloat16)
    v_scr[...] = (jnp.dot(x, wv_ref[...], preferred_element_type=jnp.float32)
                  + bv_ref[...]).astype(jnp.bfloat16)

    def batch_body(b0, carry):
        r0 = b0 * n
        if not isinstance(r0, int):
            r0 = pl.multiple_of(r0, n)
        for g in range(h):                                 # heads: static column offsets
            lo = g * f
            og = _attend(q_scr[pl.ds(r0, n), lo:lo + f],
                         k_scr[pl.ds(r0, n), lo:lo + f],
                         v_scr[pl.ds(r0, n), lo:lo + f])
            a_scr[pl.ds(r0, n), lo:lo + f] = og.astype(jnp.bfloat16)
        return carry

    if bb == 1:
        batch_body(0, 0)
    else:
        jax.lax.fori_loop(0, bb, batch_body, 0, unroll=min(bb, 8))

    # Fused lane-dense output projection and lane-dense store. dropout(p=0.0) == identity.
    out = (jnp.dot(a_scr[...], wo_ref[...], preferred_element_type=jnp.float32)
           + bo_ref[...])
    o_ref[...] = out.astype(o_ref.dtype)


def mhsa_grouped_kernel(x_ref, wq_ref, bq_ref, wk_ref, bk_ref, wv_ref, bv_ref,
                        wo_ref, bo_ref, o_ref, *, bb, n, h, f):
    """f_per_head >= 128: keep grouped (h, f, f) weights (no block-diag expansion,
    no h-times FLOP / weight-byte waste); per-head column slices stay lane-dense."""

    def batch_body(b0, carry):
        r0 = b0 * n
        if not isinstance(r0, int):
            r0 = pl.multiple_of(r0, n)
        for g in range(h):
            lo = g * f
            xg = x_ref[pl.ds(r0, n), lo:lo + f].astype(jnp.bfloat16)
            qg = jnp.dot(xg, wq_ref[g], preferred_element_type=jnp.float32) + bq_ref[g]
            kg = jnp.dot(xg, wk_ref[g], preferred_element_type=jnp.float32) + bk_ref[g]
            vg = jnp.dot(xg, wv_ref[g], preferred_element_type=jnp.float32) + bv_ref[g]
            og = _attend(qg, kg, vg)
            out_g = (jnp.dot(og.astype(jnp.bfloat16), wo_ref[g],
                             preferred_element_type=jnp.float32) + bo_ref[g])
            o_ref[pl.ds(r0, n), lo:lo + f] = out_g.astype(o_ref.dtype)
        return carry

    if bb == 1:
        batch_body(0, 0)
    else:
        jax.lax.fori_loop(0, bb, batch_body, 0, unroll=min(bb, 8))


# ------------------------------------------------------------------ host-side prep


def prepare_params(params, head, f_per_head):
    """One-time weight prep (hoisted out of the forward trace): optional block-diag
    expansion, 1/sqrt(feats) fold into q, bf16 weights (MXU-native), f32 biases."""
    wq, bq, wk, bk, wv, bv, wo, bo = params
    feats = head * f_per_head
    scale = 1.0 / math.sqrt(float(feats))      # module uses 1/sqrt(feats), not 1/sqrt(f)
    use_block_diag = f_per_head < 128

    if use_block_diag:
        def w_prep(w, s=1.0):
            return (jax.scipy.linalg.block_diag(*w) * s).astype(jnp.bfloat16)

        def b_prep(bias, s=1.0):
            return (bias.reshape(1, feats) * s).astype(jnp.float32)
    else:
        def w_prep(w, s=1.0):
            return (w * s).astype(jnp.bfloat16)                       # (h, f, f)

        def b_prep(bias, s=1.0):
            return (bias.reshape(head, 1, f_per_head) * s).astype(jnp.float32)

    prepared = (w_prep(wq, scale), b_prep(bq, scale),
                w_prep(wk), b_prep(bk),
                w_prep(wv), b_prep(bv),
                w_prep(wo), b_prep(bo))
    return use_block_diag, prepared


def _vmem_capacity_bytes():
    try:
        return int(pltpu.get_tpu_info().vmem_capacity_bytes)
    except Exception:
        return 64 * 2**20          # most conservative assumption (v7x per-TC VMEM)


def _vmem_estimate_bytes(rows, feats, n, h, f, io_bytes, use_block_diag):
    est = 2 * 2 * rows * feats * io_bytes            # double-buffered x + out tiles
    if use_block_diag:
        est += 4 * feats * feats * 2                 # 4 bf16 weights, single-buffered
        est += 4 * feats * 4                         # 4 f32 biases
        est += 4 * rows * feats * 2                  # q/k/v/attn bf16 scratch slabs
    else:
        est += 4 * h * f * f * 2                     # grouped bf16 weights
        est += 4 * h * f * 4                         # grouped f32 biases
        est += 8 * n * f * 4                         # per-head q/k/v/out temporaries
    est += 3 * n * n * 4                             # live f32 score / prob tiles
    return est


def _choose_bb(b, n, feats, h, f, io_bytes, use_block_diag, row_cap=2048):
    """Largest batch chunk bb dividing b s.t. the tile fits the VMEM budget, rows stay
    <= row_cap, and (when possible) the grid keeps >= 2 steps for v7x megacore."""
    budget = int(0.55 * _vmem_capacity_bytes())

    def fits(bb):
        return (bb * n <= row_cap and
                _vmem_estimate_bytes(bb * n, feats, n, h, f, io_bytes,
                                     use_block_diag) <= budget)

    divisors = [d for d in range(1, b + 1) if b % d == 0]
    fitting = [d for d in divisors if fits(d)] or [1]
    multi_step = [d for d in fitting if b // d >= 2]
    return max(multi_step or fitting)


# ------------------------------------------------------------------ forward wrapper


def mhsa_forward(x, use_block_diag, prepared):
    """x: (b, n, head, f_per_head); prepared: output of prepare_params."""
    b, n, h, f = x.shape
    feats = h * f
    io_bytes = jnp.dtype(x.dtype).itemsize

    # Free contiguous reshape (NO HBM transpose): (b, n, h, f) -> (b*n, feats).
    xf = x.reshape(b * n, feats)

    bb = _choose_bb(b, n, feats, h, f, io_bytes, use_block_diag)
    rows = bb * n
    est = _vmem_estimate_bytes(rows, feats, n, h, f, io_bytes, use_block_diag)
    cap = _vmem_capacity_bytes()
    vmem_limit = int(min(max(2 * est, 32 * 2**20), max(cap - 8 * 2**20, 16 * 2**20)))

    cost = pl.CostEstimate(
        flops=2 * (b * n) * feats * feats * 4 + 4 * b * h * n * n * f,
        transcendentals=b * h * n * n,                          # softmax exp
        bytes_accessed=2 * b * n * feats * io_bytes
        + (4 * feats * feats + 4 * feats) * 2)

    x_spec = pl.BlockSpec((rows, feats), lambda i: (i, 0))

    def build_in_specs(weight_pipeline_mode):
        def const_spec(shape):
            return pl.BlockSpec(shape, lambda i: (0,) * len(shape),
                                pipeline_mode=weight_pipeline_mode)
        if use_block_diag:
            w_spec, b_spec = const_spec((feats, feats)), const_spec((1, feats))
        else:
            w_spec, b_spec = const_spec((h, f, f)), const_spec((h, 1, f))
        return [x_spec, w_spec, b_spec, w_spec, b_spec, w_spec, b_spec, w_spec, b_spec]

    if use_block_diag:
        kernel = functools.partial(mhsa_blockdiag_kernel, bb=bb, n=n, h=h, f=f)
        scratch = [pltpu.VMEM((rows, feats), jnp.bfloat16)] * 4   # q, k, v, attn slabs
    else:
        kernel = functools.partial(mhsa_grouped_kernel, bb=bb, n=n, h=h, f=f)
        scratch = []

    def run(weight_pipeline_mode):
        out = pl.pallas_call(
            kernel,
            out_shape=jax.ShapeDtypeStruct((b * n, feats), x.dtype),
            grid_spec=pltpu.PrefetchScalarGridSpec(
                num_scalar_prefetch=0,
                grid=(b // bb,),
                in_specs=build_in_specs(weight_pipeline_mode),
                out_specs=x_spec,
                scratch_shapes=scratch),
            compiler_params=pltpu.CompilerParams(
                dimension_semantics=("parallel",),
                vmem_limit_bytes=vmem_limit),
            cost_estimate=cost,
        )(xf, *prepared)
        return jax.block_until_ready(out)

    try:
        # Constant index_maps -> single-buffer the resident weights/biases.
        out = run(pl.Buffered(1))
    except Exception:
        # Fallback for Pallas versions without single-buffered input support.
        out = run(None)

    return out.reshape(b, n, h, f)        # free reshape back to the module's layout


# ------------------------------------------------------------------ reference & test


def mhsa_reference(x, params):
    """Pure-JAX reference mirroring the PyTorch module."""
    b, n, h, f = x.shape
    feats = h * f
    sqrt_d = float(feats) ** 0.5
    wq, bq, wk, bk, wv, bv, wo, bo = params

    def grouped_linear(inp, w, bias):  # inp: (..., g, i), w: (g, i, j), bias: (g, j)
        return jnp.einsum('...gi,gij->...gj', inp, w) + bias

    q = jnp.transpose(grouped_linear(x, wq, bq), (0, 2, 1, 3))  # (b, h, n, f)
    k = jnp.transpose(grouped_linear(x, wk, bk), (0, 2, 1, 3))
    v = jnp.transpose(grouped_linear(x, wv, bv), (0, 2, 1, 3))
    score = jax.nn.softmax(jnp.einsum('bhif,bhjf->bhij', q, k) / sqrt_d, axis=-1)
    attn = jnp.einsum('bhij,bhjf->bihf', score, v)              # (b, n, h, f)
    return grouped_linear(attn, wo, bo)


def init_params(key, head, f_per_head):
    """Deterministic kaiming-uniform-like init (shapes match GroupedLinear)."""
    bound = 1.0 / math.sqrt(f_per_head)
    keys = jax.random.split(key, 8)

    def w(k):
        return jax.random.uniform(k, (head, f_per_head, f_per_head),
                                  jnp.float32, -bound, bound)

    def b(k):
        return jax.random.uniform(k, (head, f_per_head),
                                  jnp.float32, -bound, bound)

    return (w(keys[0]), b(keys[1]),   # q
            w(keys[2]), b(keys[3]),   # k
            w(keys[4]), b(keys[5]),   # v
            w(keys[6]), b(keys[7]))   # o


if __name__ == "__main__":
    # small shapes: batch=2, seq=16, head=4, f_per_head=8  -> feats=32
    batch, seq, head, f_per_head = 2, 16, 4, 8

    key = jax.random.PRNGKey(0)
    k_x, k_p = jax.random.split(key)
    x = jax.random.normal(k_x, (batch, seq, head, f_per_head), jnp.float32)
    params = init_params(k_p, head, f_per_head)

    # One-time weight preparation (block-diag / scale fold / bf16 cast), then forward.
    use_block_diag, prepared = prepare_params(params, head, f_per_head)
    out = jax.block_until_ready(mhsa_forward(x, use_block_diag, prepared))
    ref = jax.block_until_ready(mhsa_reference(x, params))

    # tolerance covers bf16 MXU operands + the EUP approximate softmax reciprocal
    np.testing.assert_allclose(np.asarray(out), np.asarray(ref), rtol=2e-2, atol=2e-2)
    print("KERNEL_OK")
</pallas_src>

<mosaic_0001>
module attributes {stable_mosaic.version = 11 : i64} {
  func.func @mhsa_blockdiag_kernel(%arg0: i32, %arg1: memref<16x32xf32, #tpu.memory_space<vmem>>, %arg2: memref<32x32xbf16, #tpu.memory_space<vmem>>, %arg3: memref<1x32xf32, #tpu.memory_space<vmem>>, %arg4: memref<32x32xbf16, #tpu.memory_space<vmem>>, %arg5: memref<1x32xf32, #tpu.memory_space<vmem>>, %arg6: memref<32x32xbf16, #tpu.memory_space<vmem>>, %arg7: memref<1x32xf32, #tpu.memory_space<vmem>>, %arg8: memref<32x32xbf16, #tpu.memory_space<vmem>>, %arg9: memref<1x32xf32, #tpu.memory_space<vmem>>, %arg10: memref<16x32xf32, #tpu.memory_space<vmem>>, %arg11: memref<16x32xbf16, #tpu.memory_space<vmem>>, %arg12: memref<16x32xbf16, #tpu.memory_space<vmem>>, %arg13: memref<16x32xbf16, #tpu.memory_space<vmem>>, %arg14: memref<16x32xbf16, #tpu.memory_space<vmem>>) attributes {dimension_semantics = [#tpu.dimension_semantics<parallel>], iteration_bounds = array<i64: 2>, scalar_prefetch = 0 : i64, scratch_operands = 4 : i64, tpu.core_type = #tpu.core_type<tc>, window_params = [{transform_indices = @transform_0, window_bounds = array<i64: 16, 32>}, {pipeline_mode = #tpu.pipeline_mode<synchronous>, transform_indices = @transform_1, window_bounds = array<i64: 32, 32>}, {pipeline_mode = #tpu.pipeline_mode<synchronous>, transform_indices = @transform_2, window_bounds = array<i64: 1, 32>}, {pipeline_mode = #tpu.pipeline_mode<synchronous>, transform_indices = @transform_3, window_bounds = array<i64: 32, 32>}, {pipeline_mode = #tpu.pipeline_mode<synchronous>, transform_indices = @transform_4, window_bounds = array<i64: 1, 32>}, {pipeline_mode = #tpu.pipeline_mode<synchronous>, transform_indices = @transform_5, window_bounds = array<i64: 32, 32>}, {pipeline_mode = #tpu.pipeline_mode<synchronous>, transform_indices = @transform_6, window_bounds = array<i64: 1, 32>}, {pipeline_mode = #tpu.pipeline_mode<synchronous>, transform_indices = @transform_7, window_bounds = array<i64: 32, 32>}, {pipeline_mode = #tpu.pipeline_mode<synchronous>, transform_indices = @transform_8, window_bounds = array<i64: 1, 32>}, {transform_indices = @transform_9, window_bounds = array<i64: 16, 32>}]} {
    %c0 = arith.constant 0 : index
    %c0_0 = arith.constant 0 : index
    %0 = vector.load %arg1[%c0, %c0_0] : memref<16x32xf32, #tpu.memory_space<vmem>>, vector<16x32xf32>
    %1 = arith.truncf %0 : vector<16x32xf32> to vector<16x32xbf16>
    %c0_1 = arith.constant 0 : index
    %c0_2 = arith.constant 0 : index
    %2 = vector.load %arg2[%c0_1, %c0_2] : memref<32x32xbf16, #tpu.memory_space<vmem>>, vector<32x32xbf16>
    %cst = arith.constant dense<0.000000e+00> : vector<16x32xf32>
    %3 = tpu.matmul %1, %2, %cst {dimension_numbers = #tpu.dot_dimension_numbers<[1], [0], [0], [1], [0, 0, 1, 1], [], []>} : vector<16x32xbf16>, vector<32x32xbf16>, vector<16x32xf32> -> vector<16x32xf32>
    %c0_3 = arith.constant 0 : index
    %c0_4 = arith.constant 0 : index
    %4 = vector.load %arg3[%c0_3, %c0_4] : memref<1x32xf32, #tpu.memory_space<vmem>>, vector<1x32xf32>
    %5 = vector.broadcast %4 : vector<1x32xf32> to vector<16x32xf32>
    %6 = arith.addf %3, %5 : vector<16x32xf32>
    %7 = arith.truncf %6 : vector<16x32xf32> to vector<16x32xbf16>
    %c0_5 = arith.constant 0 : index
    %c0_6 = arith.constant 0 : index
    %8 = vector.load %arg11[%c0_5, %c0_6] : memref<16x32xbf16, #tpu.memory_space<vmem>>, vector<16x32xbf16>
    tpu.vector_store %arg11[%c0_5, %c0_6], %7 {strides = array<i32>} : memref<16x32xbf16, #tpu.memory_space<vmem>>, vector<16x32xbf16>,
    %c0_7 = arith.constant 0 : index
    %c0_8 = arith.constant 0 : index
    %9 = vector.load %arg4[%c0_7, %c0_8] : memref<32x32xbf16, #tpu.memory_space<vmem>>, vector<32x32xbf16>
    %cst_9 = arith.constant dense<0.000000e+00> : vector<16x32xf32>
    %10 = tpu.matmul %1, %9, %cst_9 {dimension_numbers = #tpu.dot_dimension_numbers<[1], [0], [0], [1], [0, 0, 1, 1], [], []>} : vector<16x32xbf16>, vector<32x32xbf16>, vector<16x32xf32> -> vector<16x32xf32>
    %c0_10 = arith.constant 0 : index
    %c0_11 = arith.constant 0 : index
    %11 = vector.load %arg5[%c0_10, %c0_11] : memref<1x32xf32, #tpu.memory_space<vmem>>, vector<1x32xf32>
    %12 = vector.broadcast %11 : vector<1x32xf32> to vector<16x32xf32>
    %13 = arith.addf %10, %12 : vector<16x32xf32>
    %14 = arith.truncf %13 : vector<16x32xf32> to vector<16x32xbf16>
    %c0_12 = arith.constant 0 : index
    %c0_13 = arith.constant 0 : index
    %15 = vector.load %arg12[%c0_12, %c0_13] : memref<16x32xbf16, #tpu.memory_space<vmem>>, vector<16x32xbf16>
    tpu.vector_store %arg12[%c0_12, %c0_13], %14 {strides = array<i32>} : memref<16x32xbf16, #tpu.memory_space<vmem>>, vector<16x32xbf16>,
    %c0_14 = arith.constant 0 : index
    %c0_15 = arith.constant 0 : index
    %16 = vector.load %arg6[%c0_14, %c0_15] : memref<32x32xbf16, #tpu.memory_space<vmem>>, vector<32x32xbf16>
    %cst_16 = arith.constant dense<0.000000e+00> : vector<16x32xf32>
    %17 = tpu.matmul %1, %16, %cst_16 {dimension_numbers = #tpu.dot_dimension_numbers<[1], [0], [0], [1], [0, 0, 1, 1], [], []>} : vector<16x32xbf16>, vector<32x32xbf16>, vector<16x32xf32> -> vector<16x32xf32>
    %c0_17 = arith.constant 0 : index
    %c0_18 = arith.constant 0 : index
    %18 = vector.load %arg7[%c0_17, %c0_18] : memref<1x32xf32, #tpu.memory_space<vmem>>, vector<1x32xf32>
    %19 = vector.broadcast %18 : vector<1x32xf32> to vector<16x32xf32>
    %20 = arith.addf %17, %19 : vector<16x32xf32>
    %21 = arith.truncf %20 : vector<16x32xf32> to vector<16x32xbf16>
    %c0_19 = arith.constant 0 : index
    %c0_20 = arith.constant 0 : index
    %22 = vector.load %arg13[%c0_19, %c0_20] : memref<16x32xbf16, #tpu.memory_space<vmem>>, vector<16x32xbf16>
    tpu.vector_store %arg13[%c0_19, %c0_20], %21 {strides = array<i32>} : memref<16x32xbf16, #tpu.memory_space<vmem>>, vector<16x32xbf16>,
    %c0_21 = arith.constant 0 : index
    %c0_22 = arith.constant 0 : index
    %23 = vector.load %arg11[%c0_21, %c0_22] : memref<16x32xbf16, #tpu.memory_space<vmem>>, vector<16x8xbf16>
    %c0_23 = arith.constant 0 : index
    %c0_24 = arith.constant 0 : index
    %24 = vector.load %arg12[%c0_23, %c0_24] : memref<16x32xbf16, #tpu.memory_space<vmem>>, vector<16x8xbf16>
    %c0_25 = arith.constant 0 : index
    %c0_26 = arith.constant 0 : index
    %25 = vector.load %arg13[%c0_25, %c0_26] : memref<16x32xbf16, #tpu.memory_space<vmem>>, vector<16x8xbf16>
    %cst_27 = arith.constant dense<0.000000e+00> : vector<16x16xf32>
    %26 = tpu.matmul %23, %24, %cst_27 {dimension_numbers = #tpu.dot_dimension_numbers<[1], [1], [0], [0], [0, 0, 1, 0], [], []>} : vector<16x8xbf16>, vector<16x8xbf16>, vector<16x16xf32> -> vector<16x16xf32>
    %cst_28 = arith.constant dense<0xFF800000> : vector<16xf32>
    %27 = vector.multi_reduction <maximumf>, %26, %cst_28 [1] : vector<16x16xf32> to vector<16xf32>
    %28 = vector.shape_cast %27 : vector<16xf32> to vector<16x1xf32>
    %29 = vector.broadcast %28 : vector<16x1xf32> to vector<16x16xf32>
    %30 = arith.subf %26, %29 : vector<16x16xf32>
    %31 = math.exp %30 : vector<16x16xf32>
    %cst_29 = arith.constant dense<0.000000e+00> : vector<16xf32>
    %32 = vector.multi_reduction <add>, %31, %cst_29 [1] : vector<16x16xf32> to vector<16xf32>
    %33 = vector.shape_cast %32 : vector<16xf32> to vector<16x1xf32>
    %34 = arith.truncf %31 : vector<16x16xf32> to vector<16x16xbf16>
    %cst_30 = arith.constant dense<0.000000e+00> : vector<16x8xf32>
    %35 = tpu.matmul %34, %25, %cst_30 {dimension_numbers = #tpu.dot_dimension_numbers<[1], [0], [0], [1], [0, 0, 1, 1], [], []>} : vector<16x16xbf16>, vector<16x8xbf16>, vector<16x8xf32> -> vector<16x8xf32>
    %36 = tpu.reciprocal %33 {approx = true} : vector<16x1xf32> -> vector<16x1xf32>
    %37 = vector.broadcast %36 : vector<16x1xf32> to vector<16x8xf32>
    %38 = arith.mulf %35, %37 : vector<16x8xf32>
    %39 = arith.truncf %38 : vector<16x8xf32> to vector<16x8xbf16>
    %c0_31 = arith.constant 0 : index
    %c0_32 = arith.constant 0 : index
    %40 = vector.load %arg14[%c0_31, %c0_32] : memref<16x32xbf16, #tpu.memory_space<vmem>>, vector<16x8xbf16>
    tpu.vector_store %arg14[%c0_31, %c0_32], %39 {strides = array<i32>} : memref<16x32xbf16, #tpu.memory_space<vmem>>, vector<16x8xbf16>,
    %c0_33 = arith.constant 0 : index
    %c8 = arith.constant 8 : index
    %41 = vector.load %arg11[%c0_33, %c8] : memref<16x32xbf16, #tpu.memory_space<vmem>>, vector<16x8xbf16>
    %c0_34 = arith.constant 0 : index
    %c8_35 = arith.constant 8 : index
    %42 = vector.load %arg12[%c0_34, %c8_35] : memref<16x32xbf16, #tpu.memory_space<vmem>>, vector<16x8xbf16>
    %c0_36 = arith.constant 0 : index
    %c8_37 = arith.constant 8 : index
    %43 = vector.load %arg13[%c0_36, %c8_37] : memref<16x32xbf16, #tpu.memory_space<vmem>>, vector<16x8xbf16>
    %cst_38 = arith.constant dense<0.000000e+00> : vector<16x16xf32>
    %44 = tpu.matmul %41, %42, %cst_38 {dimension_numbers = #tpu.dot_dimension_numbers<[1], [1], [0], [0], [0, 0, 1, 0], [], []>} : vector<16x8xbf16>, vector<16x8xbf16>, vector<16x16xf32> -> vector<16x16xf32>
    %cst_39 = arith.constant dense<0xFF800000> : vector<16xf32>
    %45 = vector.multi_reduction <maximumf>, %44, %cst_39 [1] : vector<16x16xf32> to vector<16xf32>
    %46 = vector.shape_cast %45 : vector<16xf32> to vector<16x1xf32>
    %47 = vector.broadcast %46 : vector<16x1xf32> to vector<16x16xf32>
    %48 = arith.subf %44, %47 : vector<16x16xf32>
    %49 = math.exp %48 : vector<16x16xf32>
    %cst_40 = arith.constant dense<0.000000e+00> : vector<16xf32>
    %50 = vector.multi_reduction <add>, %49, %cst_40 [1] : vector<16x16xf32> to vector<16xf32>
    %51 = vector.shape_cast %50 : vector<16xf32> to vector<16x1xf32>
    %52 = arith.truncf %49 : vector<16x16xf32> to vector<16x16xbf16>
    %cst_41 = arith.constant dense<0.000000e+00> : vector<16x8xf32>
    %53 = tpu.matmul %52, %43, %cst_41 {dimension_numbers = #tpu.dot_dimension_numbers<[1], [0], [0], [1], [0, 0, 1, 1], [], []>} : vector<16x16xbf16>, vector<16x8xbf16>, vector<16x8xf32> -> vector<16x8xf32>
    %54 = tpu.reciprocal %51 {approx = true} : vector<16x1xf32> -> vector<16x1xf32>
    %55 = vector.broadcast %54 : vector<16x1xf32> to vector<16x8xf32>
    %56 = arith.mulf %53, %55 : vector<16x8xf32>
    %57 = arith.truncf %56 : vector<16x8xf32> to vector<16x8xbf16>
    %c0_42 = arith.constant 0 : index
    %c8_43 = arith.constant 8 : index
    %58 = vector.load %arg14[%c0_42, %c8_43] : memref<16x32xbf16, #tpu.memory_space<vmem>>, vector<16x8xbf16>
    tpu.vector_store %arg14[%c0_42, %c8_43], %57 {strides = array<i32>} : memref<16x32xbf16, #tpu.memory_space<vmem>>, vector<16x8xbf16>,
    %c0_44 = arith.constant 0 : index
    %c16 = arith.constant 16 : index
    %59 = vector.load %arg11[%c0_44, %c16] : memref<16x32xbf16, #tpu.memory_space<vmem>>, vector<16x8xbf16>
    %c0_45 = arith.constant 0 : index
    %c16_46 = arith.constant 16 : index
    %60 = vector.load %arg12[%c0_45, %c16_46] : memref<16x32xbf16, #tpu.memory_space<vmem>>, vector<16x8xbf16>
    %c0_47 = arith.constant 0 : index
    %c16_48 = arith.constant 16 : index
    %61 = vector.load %arg13[%c0_47, %c16_48] : memref<16x32xbf16, #tpu.memory_space<vmem>>, vector<16x8xbf16>
    %cst_49 = arith.constant dense<0.000000e+00> : vector<16x16xf32>
    %62 = tpu.matmul %59, %60, %cst_49 {dimension_numbers = #tpu.dot_dimension_numbers<[1], [1], [0], [0], [0, 0, 1, 0], [], []>} : vector<16x8xbf16>, vector<16x8xbf16>, vector<16x16xf32> -> vector<16x16xf32>
    %cst_50 = arith.constant dense<0xFF800000> : vector<16xf32>
    %63 = vector.multi_reduction <maximumf>, %62, %cst_50 [1] : vector<16x16xf32> to vector<16xf32>
    %64 = vector.shape_cast %63 : vector<16xf32> to vector<16x1xf32>
    %65 = vector.broadcast %64 : vector<16x1xf32> to vector<16x16xf32>
    %66 = arith.subf %62, %65 : vector<16x16xf32>
    %67 = math.exp %66 : vector<16x16xf32>
    %cst_51 = arith.constant dense<0.000000e+00> : vector<16xf32>
    %68 = vector.multi_reduction <add>, %67, %cst_51 [1] : vector<16x16xf32> to vector<16xf32>
    %69 = vector.shape_cast %68 : vector<16xf32> to vector<16x1xf32>
    %70 = arith.truncf %67 : vector<16x16xf32> to vector<16x16xbf16>
    %cst_52 = arith.constant dense<0.000000e+00> : vector<16x8xf32>
    %71 = tpu.matmul %70, %61, %cst_52 {dimension_numbers = #tpu.dot_dimension_numbers<[1], [0], [0], [1], [0, 0, 1, 1], [], []>} : vector<16x16xbf16>, vector<16x8xbf16>, vector<16x8xf32> -> vector<16x8xf32>
    %72 = tpu.reciprocal %69 {approx = true} : vector<16x1xf32> -> vector<16x1xf32>
    %73 = vector.broadcast %72 : vector<16x1xf32> to vector<16x8xf32>
    %74 = arith.mulf %71, %73 : vector<16x8xf32>
    %75 = arith.truncf %74 : vector<16x8xf32> to vector<16x8xbf16>
    %c0_53 = arith.constant 0 : index
    %c16_54 = arith.constant 16 : index
    %76 = vector.load %arg14[%c0_53, %c16_54] : memref<16x32xbf16, #tpu.memory_space<vmem>>, vector<16x8xbf16>
    tpu.vector_store %arg14[%c0_53, %c16_54], %75 {strides = array<i32>} : memref<16x32xbf16, #tpu.memory_space<vmem>>, vector<16x8xbf16>,
    %c0_55 = arith.constant 0 : index
    %c24 = arith.constant 24 : index
    %77 = vector.load %arg11[%c0_55, %c24] : memref<16x32xbf16, #tpu.memory_space<vmem>>, vector<16x8xbf16>
    %c0_56 = arith.constant 0 : index
    %c24_57 = arith.constant 24 : index
    %78 = vector.load %arg12[%c0_56, %c24_57] : memref<16x32xbf16, #tpu.memory_space<vmem>>, vector<16x8xbf16>
    %c0_58 = arith.constant 0 : index
    %c24_59 = arith.constant 24 : index
    %79 = vector.load %arg13[%c0_58, %c24_59] : memref<16x32xbf16, #tpu.memory_space<vmem>>, vector<16x8xbf16>
    %cst_60 = arith.constant dense<0.000000e+00> : vector<16x16xf32>
    %80 = tpu.matmul %77, %78, %cst_60 {dimension_numbers = #tpu.dot_dimension_numbers<[1], [1], [0], [0], [0, 0, 1, 0], [], []>} : vector<16x8xbf16>, vector<16x8xbf16>, vector<16x16xf32> -> vector<16x16xf32>
    %cst_61 = arith.constant dense<0xFF800000> : vector<16xf32>
    %81 = vector.multi_reduction <maximumf>, %80, %cst_61 [1] : vector<16x16xf32> to vector<16xf32>
    %82 = vector.shape_cast %81 : vector<16xf32> to vector<16x1xf32>
    %83 = vector.broadcast %82 : vector<16x1xf32> to vector<16x16xf32>
    %84 = arith.subf %80, %83 : vector<16x16xf32>
    %85 = math.exp %84 : vector<16x16xf32>
    %cst_62 = arith.constant dense<0.000000e+00> : vector<16xf32>
    %86 = vector.multi_reduction <add>, %85, %cst_62 [1] : vector<16x16xf32> to vector<16xf32>
    %87 = vector.shape_cast %86 : vector<16xf32> to vector<16x1xf32>
    %88 = arith.truncf %85 : vector<16x16xf32> to vector<16x16xbf16>
    %cst_63 = arith.constant dense<0.000000e+00> : vector<16x8xf32>
    %89 = tpu.matmul %88, %79, %cst_63 {dimension_numbers = #tpu.dot_dimension_numbers<[1], [0], [0], [1], [0, 0, 1, 1], [], []>} : vector<16x16xbf16>, vector<16x8xbf16>, vector<16x8xf32> -> vector<16x8xf32>
    %90 = tpu.reciprocal %87 {approx = true} : vector<16x1xf32> -> vector<16x1xf32>
    %91 = vector.broadcast %90 : vector<16x1xf32> to vector<16x8xf32>
    %92 = arith.mulf %89, %91 : vector<16x8xf32>
    %93 = arith.truncf %92 : vector<16x8xf32> to vector<16x8xbf16>
    %c0_64 = arith.constant 0 : index
    %c24_65 = arith.constant 24 : index
    %94 = vector.load %arg14[%c0_64, %c24_65] : memref<16x32xbf16, #tpu.memory_space<vmem>>, vector<16x8xbf16>
    tpu.vector_store %arg14[%c0_64, %c24_65], %93 {strides = array<i32>} : memref<16x32xbf16, #tpu.memory_space<vmem>>, vector<16x8xbf16>,
    %c0_66 = arith.constant 0 : index
    %c0_67 = arith.constant 0 : index
    %95 = vector.load %arg14[%c0_66, %c0_67] : memref<16x32xbf16, #tpu.memory_space<vmem>>, vector<16x32xbf16>
    %c0_68 = arith.constant 0 : index
    %c0_69 = arith.constant 0 : index
    %96 = vector.load %arg8[%c0_68, %c0_69] : memref<32x32xbf16, #tpu.memory_space<vmem>>, vector<32x32xbf16>
    %cst_70 = arith.constant dense<0.000000e+00> : vector<16x32xf32>
    %97 = tpu.matmul %95, %96, %cst_70 {dimension_numbers = #tpu.dot_dimension_numbers<[1], [0], [0], [1], [0, 0, 1, 1], [], []>} : vector<16x32xbf16>, vector<32x32xbf16>, vector<16x32xf32> -> vector<16x32xf32>
    %c0_71 = arith.constant 0 : index
    %c0_72 = arith.constant 0 : index
    %98 = vector.load %arg9[%c0_71, %c0_72] : memref<1x32xf32, #tpu.memory_space<vmem>>, vector<1x32xf32>
    %99 = vector.broadcast %98 : vector<1x32xf32> to vector<16x32xf32>
    %100 = arith.addf %97, %99 : vector<16x32xf32>
    %c0_73 = arith.constant 0 : index
    %c0_74 = arith.constant 0 : index
    %101 = vector.load %arg10[%c0_73, %c0_74] : memref<16x32xf32, #tpu.memory_space<vmem>>, vector<16x32xf32>
    tpu.vector_store %arg10[%c0_73, %c0_74], %100 {strides = array<i32>} : memref<16x32xf32, #tpu.memory_space<vmem>>, vector<16x32xf32>,
    return
  }
  func.func @transform_0(%arg0: i32) -> (i32, i32) {
    %c0_i32 = arith.constant 0 : i32
    %c0_i32_0 = arith.constant 0 : i32
    return %arg0, %c0_i32 : i32, i32
  }
  func.func @transform_1(%arg0: i32) -> (i32, i32) {
    %c0_i32 = arith.constant 0 : i32
    %c0_i32_0 = arith.constant 0 : i32
    %c0_i32_1 = arith.constant 0 : i32
    return %c0_i32, %c0_i32_0 : i32, i32
  }
  func.func @transform_2(%arg0: i32) -> (i32, i32) {
    %c0_i32 = arith.constant 0 : i32
    %c0_i32_0 = arith.constant 0 : i32
    %c0_i32_1 = arith.constant 0 : i32
    return %c0_i32, %c0_i32_0 : i32, i32
  }
  func.func @transform_3(%arg0: i32) -> (i32, i32) {
    %c0_i32 = arith.constant 0 : i32
    %c0_i32_0 = arith.constant 0 : i32
    %c0_i32_1 = arith.constant 0 : i32
    return %c0_i32, %c0_i32_0 : i32, i32
  }
  func.func @transform_4(%arg0: i32) -> (i32, i32) {
    %c0_i32 = arith.constant 0 : i32
    %c0_i32_0 = arith.constant 0 : i32
    %c0_i32_1 = arith.constant 0 : i32
    return %c0_i32, %c0_i32_0 : i32, i32
  }
  func.func @transform_5(%arg0: i32) -> (i32, i32) {
    %c0_i32 = arith.constant 0 : i32
    %c0_i32_0 = arith.constant 0 : i32
    %c0_i32_1 = arith.constant 0 : i32
    return %c0_i32, %c0_i32_0 : i32, i32
  }
  func.func @transform_6(%arg0: i32) -> (i32, i32) {
    %c0_i32 = arith.constant 0 : i32
    %c0_i32_0 = arith.constant 0 : i32
    %c0_i32_1 = arith.constant 0 : i32
    return %c0_i32, %c0_i32_0 : i32, i32
  }
  func.func @transform_7(%arg0: i32) -> (i32, i32) {
    %c0_i32 = arith.constant 0 : i32
    %c0_i32_0 = arith.constant 0 : i32
    %c0_i32_1 = arith.constant 0 : i32
    return %c0_i32, %c0_i32_0 : i32, i32
  }
  func.func @transform_8(%arg0: i32) -> (i32, i32) {
    %c0_i32 = arith.constant 0 : i32
    %c0_i32_0 = arith.constant 0 : i32
    %c0_i32_1 = arith.constant 0 : i32
    return %c0_i32, %c0_i32_0 : i32, i32
  }
  func.func @transform_9(%arg0: i32) -> (i32, i32) {
    %c0_i32 = arith.constant 0 : i32
    %c0_i32_0 = arith.constant 0 : i32
    return %arg0, %c0_i32 : i32, i32
  }
}

module attributes {stable_mosaic.version = 11 : i64} {
  func.func @mhsa_blockdiag_kernel(%arg0: i32, %arg1: memref<16x32xf32, #tpu.memory_space<vmem>>, %arg2: memref<32x32xbf16, #tpu.memory_space<vmem>>, %arg3: memref<1x32xf32, #tpu.memory_space<vmem>>, %arg4: memref<32x32xbf16, #tpu.memory_space<vmem>>, %arg5: memref<1x32xf32, #tpu.memory_space<vmem>>, %arg6: memref<32x32xbf16, #tpu.memory_space<vmem>>, %arg7: memref<1x32xf32, #tpu.memory_space<vmem>>, %arg8: memref<32x32xbf16, #tpu.memory_space<vmem>>, %arg9: memref<1x32xf32, #tpu.memory_space<vmem>>, %arg10: memref<16x32xf32, #tpu.memory_space<vmem>>, %arg11: memref<16x32xbf16, #tpu.memory_space<vmem>>, %arg12: memref<16x32xbf16, #tpu.memory_space<vmem>>, %arg13: memref<16x32xbf16, #tpu.memory_space<vmem>>, %arg14: memref<16x32xbf16, #tpu.memory_space<vmem>>) attributes {dimension_semantics = [#tpu.dimension_semantics<parallel>], iteration_bounds = array<i64: 2>, scalar_prefetch = 0 : i64, scratch_operands = 4 : i64, tpu.core_type = #tpu.core_type<tc>, window_params = [{transform_indices = @transform_0, window_bounds = array<i64: 16, 32>}, {pipeline_mode = #tpu.pipeline_mode<synchronous>, transform_indices = @transform_1, window_bounds = array<i64: 32, 32>}, {pipeline_mode = #tpu.pipeline_mode<synchronous>, transform_indices = @transform_2, window_bounds = array<i64: 1, 32>}, {pipeline_mode = #tpu.pipeline_mode<synchronous>, transform_indices = @transform_3, window_bounds = array<i64: 32, 32>}, {pipeline_mode = #tpu.pipeline_mode<synchronous>, transform_indices = @transform_4, window_bounds = array<i64: 1, 32>}, {pipeline_mode = #tpu.pipeline_mode<synchronous>, transform_indices = @transform_5, window_bounds = array<i64: 32, 32>}, {pipeline_mode = #tpu.pipeline_mode<synchronous>, transform_indices = @transform_6, window_bounds = array<i64: 1, 32>}, {pipeline_mode = #tpu.pipeline_mode<synchronous>, transform_indices = @transform_7, window_bounds = array<i64: 32, 32>}, {pipeline_mode = #tpu.pipeline_mode<synchronous>, transform_indices = @transform_8, window_bounds = array<i64: 1, 32>}, {transform_indices = @transform_9, window_bounds = array<i64: 16, 32>}]} {
    %c0 = arith.constant 0 : index
    %c0_0 = arith.constant 0 : index
    %0 = vector.load %arg1[%c0, %c0_0] : memref<16x32xf32, #tpu.memory_space<vmem>>, vector<16x32xf32>
    %1 = arith.truncf %0 : vector<16x32xf32> to vector<16x32xbf16>
    %c0_1 = arith.constant 0 : index
    %c0_2 = arith.constant 0 : index
    %2 = vector.load %arg2[%c0_1, %c0_2] : memref<32x32xbf16, #tpu.memory_space<vmem>>, vector<32x32xbf16>
    %cst = arith.constant dense<0.000000e+00> : vector<16x32xf32>
    %3 = tpu.matmul %1, %2, %cst {dimension_numbers = #tpu.dot_dimension_numbers<[1], [0], [0], [1], [0, 0, 1, 1], [], []>} : vector<16x32xbf16>, vector<32x32xbf16>, vector<16x32xf32> -> vector<16x32xf32>
    %c0_3 = arith.constant 0 : index
    %c0_4 = arith.constant 0 : index
    %4 = vector.load %arg3[%c0_3, %c0_4] : memref<1x32xf32, #tpu.memory_space<vmem>>, vector<1x32xf32>
    %5 = vector.broadcast %4 : vector<1x32xf32> to vector<16x32xf32>
    %6 = arith.addf %3, %5 : vector<16x32xf32>
    %7 = arith.truncf %6 : vector<16x32xf32> to vector<16x32xbf16>
    %c0_5 = arith.constant 0 : index
    %c0_6 = arith.constant 0 : index
    %8 = vector.load %arg11[%c0_5, %c0_6] : memref<16x32xbf16, #tpu.memory_space<vmem>>, vector<16x32xbf16>
    tpu.vector_store %arg11[%c0_5, %c0_6], %7 {strides = array<i32>} : memref<16x32xbf16, #tpu.memory_space<vmem>>, vector<16x32xbf16>,
    %c0_7 = arith.constant 0 : index
    %c0_8 = arith.constant 0 : index
    %9 = vector.load %arg4[%c0_7, %c0_8] : memref<32x32xbf16, #tpu.memory_space<vmem>>, vector<32x32xbf16>
    %cst_9 = arith.constant dense<0.000000e+00> : vector<16x32xf32>
    %10 = tpu.matmul %1, %9, %cst_9 {dimension_numbers = #tpu.dot_dimension_numbers<[1], [0], [0], [1], [0, 0, 1, 1], [], []>} : vector<16x32xbf16>, vector<32x32xbf16>, vector<16x32xf32> -> vector<16x32xf32>
    %c0_10 = arith.constant 0 : index
    %c0_11 = arith.constant 0 : index
    %11 = vector.load %arg5[%c0_10, %c0_11] : memref<1x32xf32, #tpu.memory_space<vmem>>, vector<1x32xf32>
    %12 = vector.broadcast %11 : vector<1x32xf32> to vector<16x32xf32>
    %13 = arith.addf %10, %12 : vector<16x32xf32>
    %14 = arith.truncf %13 : vector<16x32xf32> to vector<16x32xbf16>
    %c0_12 = arith.constant 0 : index
    %c0_13 = arith.constant 0 : index
    %15 = vector.load %arg12[%c0_12, %c0_13] : memref<16x32xbf16, #tpu.memory_space<vmem>>, vector<16x32xbf16>
    tpu.vector_store %arg12[%c0_12, %c0_13], %14 {strides = array<i32>} : memref<16x32xbf16, #tpu.memory_space<vmem>>, vector<16x32xbf16>,
    %c0_14 = arith.constant 0 : index
    %c0_15 = arith.constant 0 : index
    %16 = vector.load %arg6[%c0_14, %c0_15] : memref<32x32xbf16, #tpu.memory_space<vmem>>, vector<32x32xbf16>
    %cst_16 = arith.constant dense<0.000000e+00> : vector<16x32xf32>
    %17 = tpu.matmul %1, %16, %cst_16 {dimension_numbers = #tpu.dot_dimension_numbers<[1], [0], [0], [1], [0, 0, 1, 1], [], []>} : vector<16x32xbf16>, vector<32x32xbf16>, vector<16x32xf32> -> vector<16x32xf32>
    %c0_17 = arith.constant 0 : index
    %c0_18 = arith.constant 0 : index
    %18 = vector.load %arg7[%c0_17, %c0_18] : memref<1x32xf32, #tpu.memory_space<vmem>>, vector<1x32xf32>
    %19 = vector.broadcast %18 : vector<1x32xf32> to vector<16x32xf32>
    %20 = arith.addf %17, %19 : vector<16x32xf32>
    %21 = arith.truncf %20 : vector<16x32xf32> to vector<16x32xbf16>
    %c0_19 = arith.constant 0 : index
    %c0_20 = arith.constant 0 : index
    %22 = vector.load %arg13[%c0_19, %c0_20] : memref<16x32xbf16, #tpu.memory_space<vmem>>, vector<16x32xbf16>
    tpu.vector_store %arg13[%c0_19, %c0_20], %21 {strides = array<i32>} : memref<16x32xbf16, #tpu.memory_space<vmem>>, vector<16x32xbf16>,
    %c0_21 = arith.constant 0 : index
    %c0_22 = arith.constant 0 : index
    %23 = vector.load %arg11[%c0_21, %c0_22] : memref<16x32xbf16, #tpu.memory_space<vmem>>, vector<16x8xbf16>
    %c0_23 = arith.constant 0 : index
    %c0_24 = arith.constant 0 : index
    %24 = vector.load %arg12[%c0_23, %c0_24] : memref<16x32xbf16, #tpu.memory_space<vmem>>, vector<16x8xbf16>
    %c0_25 = arith.constant 0 : index
    %c0_26 = arith.constant 0 : index
    %25 = vector.load %arg13[%c0_25, %c0_26] : memref<16x32xbf16, #tpu.memory_space<vmem>>, vector<16x8xbf16>
    %cst_27 = arith.constant dense<0.000000e+00> : vector<16x16xf32>
    %26 = tpu.matmul %23, %24, %cst_27 {dimension_numbers = #tpu.dot_dimension_numbers<[1], [1], [0], [0], [0, 0, 1, 0], [], []>} : vector<16x8xbf16>, vector<16x8xbf16>, vector<16x16xf32> -> vector<16x16xf32>
    %cst_28 = arith.constant dense<0xFF800000> : vector<16xf32>
    %27 = vector.multi_reduction <maximumf>, %26, %cst_28 [1] : vector<16x16xf32> to vector<16xf32>
    %28 = vector.shape_cast %27 : vector<16xf32> to vector<16x1xf32>
    %29 = vector.broadcast %28 : vector<16x1xf32> to vector<16x16xf32>
    %30 = arith.subf %26, %29 : vector<16x16xf32>
    %31 = math.exp %30 : vector<16x16xf32>
    %cst_29 = arith.constant dense<0.000000e+00> : vector<16xf32>
    %32 = vector.multi_reduction <add>, %31, %cst_29 [1] : vector<16x16xf32> to vector<16xf32>
    %33 = vector.shape_cast %32 : vector<16xf32> to vector<16x1xf32>
    %34 = arith.truncf %31 : vector<16x16xf32> to vector<16x16xbf16>
    %cst_30 = arith.constant dense<0.000000e+00> : vector<16x8xf32>
    %35 = tpu.matmul %34, %25, %cst_30 {dimension_numbers = #tpu.dot_dimension_numbers<[1], [0], [0], [1], [0, 0, 1, 1], [], []>} : vector<16x16xbf16>, vector<16x8xbf16>, vector<16x8xf32> -> vector<16x8xf32>
    %36 = tpu.reciprocal %33 {approx = true} : vector<16x1xf32> -> vector<16x1xf32>
    %37 = vector.broadcast %36 : vector<16x1xf32> to vector<16x8xf32>
    %38 = arith.mulf %35, %37 : vector<16x8xf32>
    %39 = arith.truncf %38 : vector<16x8xf32> to vector<16x8xbf16>
    %c0_31 = arith.constant 0 : index
    %c0_32 = arith.constant 0 : index
    %40 = vector.load %arg14[%c0_31, %c0_32] : memref<16x32xbf16, #tpu.memory_space<vmem>>, vector<16x8xbf16>
    tpu.vector_store %arg14[%c0_31, %c0_32], %39 {strides = array<i32>} : memref<16x32xbf16, #tpu.memory_space<vmem>>, vector<16x8xbf16>,
    %c0_33 = arith.constant 0 : index
    %c8 = arith.constant 8 : index
    %41 = vector.load %arg11[%c0_33, %c8] : memref<16x32xbf16, #tpu.memory_space<vmem>>, vector<16x8xbf16>
    %c0_34 = arith.constant 0 : index
    %c8_35 = arith.constant 8 : index
    %42 = vector.load %arg12[%c0_34, %c8_35] : memref<16x32xbf16, #tpu.memory_space<vmem>>, vector<16x8xbf16>
    %c0_36 = arith.constant 0 : index
    %c8_37 = arith.constant 8 : index
    %43 = vector.load %arg13[%c0_36, %c8_37] : memref<16x32xbf16, #tpu.memory_space<vmem>>, vector<16x8xbf16>
    %cst_38 = arith.constant dense<0.000000e+00> : vector<16x16xf32>
    %44 = tpu.matmul %41, %42, %cst_38 {dimension_numbers = #tpu.dot_dimension_numbers<[1], [1], [0], [0], [0, 0, 1, 0], [], []>} : vector<16x8xbf16>, vector<16x8xbf16>, vector<16x16xf32> -> vector<16x16xf32>
    %cst_39 = arith.constant dense<0xFF800000> : vector<16xf32>
    %45 = vector.multi_reduction <maximumf>, %44, %cst_39 [1] : vector<16x16xf32> to vector<16xf32>
    %46 = vector.shape_cast %45 : vector<16xf32> to vector<16x1xf32>
    %47 = vector.broadcast %46 : vector<16x1xf32> to vector<16x16xf32>
    %48 = arith.subf %44, %47 : vector<16x16xf32>
    %49 = math.exp %48 : vector<16x16xf32>
    %cst_40 = arith.constant dense<0.000000e+00> : vector<16xf32>
    %50 = vector.multi_reduction <add>, %49, %cst_40 [1] : vector<16x16xf32> to vector<16xf32>
    %51 = vector.shape_cast %50 : vector<16xf32> to vector<16x1xf32>
    %52 = arith.truncf %49 : vector<16x16xf32> to vector<16x16xbf16>
    %cst_41 = arith.constant dense<0.000000e+00> : vector<16x8xf32>
    %53 = tpu.matmul %52, %43, %cst_41 {dimension_numbers = #tpu.dot_dimension_numbers<[1], [0], [0], [1], [0, 0, 1, 1], [], []>} : vector<16x16xbf16>, vector<16x8xbf16>, vector<16x8xf32> -> vector<16x8xf32>
    %54 = tpu.reciprocal %51 {approx = true} : vector<16x1xf32> -> vector<16x1xf32>
    %55 = vector.broadcast %54 : vector<16x1xf32> to vector<16x8xf32>
    %56 = arith.mulf %53, %55 : vector<16x8xf32>
    %57 = arith.truncf %56 : vector<16x8xf32> to vector<16x8xbf16>
    %c0_42 = arith.constant 0 : index
    %c8_43 = arith.constant 8 : index
    %58 = vector.load %arg14[%c0_42, %c8_43] : memref<16x32xbf16, #tpu.memory_space<vmem>>, vector<16x8xbf16>
    tpu.vector_store %arg14[%c0_42, %c8_43], %57 {strides = array<i32>} : memref<16x32xbf16, #tpu.memory_space<vmem>>, vector<16x8xbf16>,
    %c0_44 = arith.constant 0 : index
    %c16 = arith.constant 16 : index
    %59 = vector.load %arg11[%c0_44, %c16] : memref<16x32xbf16, #tpu.memory_space<vmem>>, vector<16x8xbf16>
    %c0_45 = arith.constant 0 : index
    %c16_46 = arith.constant 16 : index
    %60 = vector.load %arg12[%c0_45, %c16_46] : memref<16x32xbf16, #tpu.memory_space<vmem>>, vector<16x8xbf16>
    %c0_47 = arith.constant 0 : index
    %c16_48 = arith.constant 16 : index
    %61 = vector.load %arg13[%c0_47, %c16_48] : memref<16x32xbf16, #tpu.memory_space<vmem>>, vector<16x8xbf16>
    %cst_49 = arith.constant dense<0.000000e+00> : vector<16x16xf32>
    %62 = tpu.matmul %59, %60, %cst_49 {dimension_numbers = #tpu.dot_dimension_numbers<[1], [1], [0], [0], [0, 0, 1, 0], [], []>} : vector<16x8xbf16>, vector<16x8xbf16>, vector<16x16xf32> -> vector<16x16xf32>
    %cst_50 = arith.constant dense<0xFF800000> : vector<16xf32>
    %63 = vector.multi_reduction <maximumf>, %62, %cst_50 [1] : vector<16x16xf32> to vector<16xf32>
    %64 = vector.shape_cast %63 : vector<16xf32> to vector<16x1xf32>
    %65 = vector.broadcast %64 : vector<16x1xf32> to vector<16x16xf32>
    %66 = arith.subf %62, %65 : vector<16x16xf32>
    %67 = math.exp %66 : vector<16x16xf32>
    %cst_51 = arith.constant dense<0.000000e+00> : vector<16xf32>
    %68 = vector.multi_reduction <add>, %67, %cst_51 [1] : vector<16x16xf32> to vector<16xf32>
    %69 = vector.shape_cast %68 : vector<16xf32> to vector<16x1xf32>
    %70 = arith.truncf %67 : vector<16x16xf32> to vector<16x16xbf16>
    %cst_52 = arith.constant dense<0.000000e+00> : vector<16x8xf32>
    %71 = tpu.matmul %70, %61, %cst_52 {dimension_numbers = #tpu.dot_dimension_numbers<[1], [0], [0], [1], [0, 0, 1, 1], [], []>} : vector<16x16xbf16>, vector<16x8xbf16>, vector<16x8xf32> -> vector<16x8xf32>
    %72 = tpu.reciprocal %69 {approx = true} : vector<16x1xf32> -> vector<16x1xf32>
    %73 = vector.broadcast %72 : vector<16x1xf32> to vector<16x8xf32>
    %74 = arith.mulf %71, %73 : vector<16x8xf32>
    %75 = arith.truncf %74 : vector<16x8xf32> to vector<16x8xbf16>
    %c0_53 = arith.constant 0 : index
    %c16_54 = arith.constant 16 : index
    %76 = vector.load %arg14[%c0_53, %c16_54] : memref<16x32xbf16, #tpu.memory_space<vmem>>, vector<16x8xbf16>
    tpu.vector_store %arg14[%c0_53, %c16_54], %75 {strides = array<i32>} : memref<16x32xbf16, #tpu.memory_space<vmem>>, vector<16x8xbf16>,
    %c0_55 = arith.constant 0 : index
    %c24 = arith.constant 24 : index
    %77 = vector.load %arg11[%c0_55, %c24] : memref<16x32xbf16, #tpu.memory_space<vmem>>, vector<16x8xbf16>
    %c0_56 = arith.constant 0 : index
    %c24_57 = arith.constant 24 : index
    %78 = vector.load %arg12[%c0_56, %c24_57] : memref<16x32xbf16, #tpu.memory_space<vmem>>, vector<16x8xbf16>
    %c0_58 = arith.constant 0 : index
    %c24_59 = arith.constant 24 : index
    %79 = vector.load %arg13[%c0_58, %c24_59] : memref<16x32xbf16, #tpu.memory_space<vmem>>, vector<16x8xbf16>
    %cst_60 = arith.constant dense<0.000000e+00> : vector<16x16xf32>
    %80 = tpu.matmul %77, %78, %cst_60 {dimension_numbers = #tpu.dot_dimension_numbers<[1], [1], [0], [0], [0, 0, 1, 0], [], []>} : vector<16x8xbf16>, vector<16x8xbf16>, vector<16x16xf32> -> vector<16x16xf32>
    %cst_61 = arith.constant dense<0xFF800000> : vector<16xf32>
    %81 = vector.multi_reduction <maximumf>, %80, %cst_61 [1] : vector<16x16xf32> to vector<16xf32>
    %82 = vector.shape_cast %81 : vector<16xf32> to vector<16x1xf32>
    %83 = vector.broadcast %82 : vector<16x1xf32> to vector<16x16xf32>
    %84 = arith.subf %80, %83 : vector<16x16xf32>
    %85 = math.exp %84 : vector<16x16xf32>
    %cst_62 = arith.constant dense<0.000000e+00> : vector<16xf32>
    %86 = vector.multi_reduction <add>, %85, %cst_62 [1] : vector<16x16xf32> to vector<16xf32>
    %87 = vector.shape_cast %86 : vector<16xf32> to vector<16x1xf32>
    %88 = arith.truncf %85 : vector<16x16xf32> to vector<16x16xbf16>
    %cst_63 = arith.constant dense<0.000000e+00> : vector<16x8xf32>
    %89 = tpu.matmul %88, %79, %cst_63 {dimension_numbers = #tpu.dot_dimension_numbers<[1], [0], [0], [1], [0, 0, 1, 1], [], []>} : vector<16x16xbf16>, vector<16x8xbf16>, vector<16x8xf32> -> vector<16x8xf32>
    %90 = tpu.reciprocal %87 {approx = true} : vector<16x1xf32> -> vector<16x1xf32>
    %91 = vector.broadcast %90 : vector<16x1xf32> to vector<16x8xf32>
    %92 = arith.mulf %89, %91 : vector<16x8xf32>
    %93 = arith.truncf %92 : vector<16x8xf32> to vector<16x8xbf16>
    %c0_64 = arith.constant 0 : index
    %c24_65 = arith.constant 24 : index
    %94 = vector.load %arg14[%c0_64, %c24_65] : memref<16x32xbf16, #tpu.memory_space<vmem>>, vector<16x8xbf16>
    tpu.vector_store %arg14[%c0_64, %c24_65], %93 {strides = array<i32>} : memref<16x32xbf16, #tpu.memory_space<vmem>>, vector<16x8xbf16>,
    %c0_66 = arith.constant 0 : index
    %c0_67 = arith.constant 0 : index
    %95 = vector.load %arg14[%c0_66, %c0_67] : memref<16x32xbf16, #tpu.memory_space<vmem>>, vector<16x32xbf16>
    %c0_68 = arith.constant 0 : index
    %c0_69 = arith.constant 0 : index
    %96 = vector.load %arg8[%c0_68, %c0_69] : memref<32x32xbf16, #tpu.memory_space<vmem>>, vector<32x32xbf16>
    %cst_70 = arith.constant dense<0.000000e+00> : vector<16x32xf32>
    %97 = tpu.matmul %95, %96, %cst_70 {dimension_numbers = #tpu.dot_dimension_numbers<[1], [0], [0], [1], [0, 0, 1, 1], [], []>} : vector<16x32xbf16>, vector<32x32xbf16>, vector<16x32xf32> -> vector<16x32xf32>
    %c0_71 = arith.constant 0 : index
    %c0_72 = arith.constant 0 : index
    %98 = vector.load %arg9[%c0_71, %c0_72] : memref<1x32xf32, #tpu.memory_space<vmem>>, vector<1x32xf32>
    %99 = vector.broadcast %98 : vector<1x32xf32> to vector<16x32xf32>
    %100 = arith.addf %97, %99 : vector<16x32xf32>
    %c0_73 = arith.constant 0 : index
    %c0_74 = arith.constant 0 : index
    %101 = vector.load %arg10[%c0_73, %c0_74] : memref<16x32xf32, #tpu.memory_space<vmem>>, vector<16x32xf32>
    tpu.vector_store %arg10[%c0_73, %c0_74], %100 {strides = array<i32>} : memref<16x32xf32, #tpu.memory_space<vmem>>, vector<16x32xf32>,
    return
  }
  func.func @transform_0(%arg0: i32) -> (i32, i32) {
    %c0_i32 = arith.constant 0 : i32
    %c0_i32_0 = arith.constant 0 : i32
    return %arg0, %c0_i32 : i32, i32
  }
  func.func @transform_1(%arg0: i32) -> (i32, i32) {
    %c0_i32 = arith.constant 0 : i32
    %c0_i32_0 = arith.constant 0 : i32
    %c0_i32_1 = arith.constant 0 : i32
    return %c0_i32, %c0_i32_0 : i32, i32
  }
  func.func @transform_2(%arg0: i32) -> (i32, i32) {
    %c0_i32 = arith.constant 0 : i32
    %c0_i32_0 = arith.constant 0 : i32
    %c0_i32_1 = arith.constant 0 : i32
    return %c0_i32, %c0_i32_0 : i32, i32
  }
  func.func @transform_3(%arg0: i32) -> (i32, i32) {
    %c0_i32 = arith.constant 0 : i32
    %c0_i32_0 = arith.constant 0 : i32
    %c0_i32_1 = arith.constant 0 : i32
    return %c0_i32, %c0_i32_0 : i32, i32
  }
  func.func @transform_4(%arg0: i32) -> (i32, i32) {
    %c0_i32 = arith.constant 0 : i32
    %c0_i32_0 = arith.constant 0 : i32
    %c0_i32_1 = arith.constant 0 : i32
    return %c0_i32, %c0_i32_0 : i32, i32
  }
  func.func @transform_5(%arg0: i32) -> (i32, i32) {
    %c0_i32 = arith.constant 0 : i32
    %c0_i32_0 = arith.constant 0 : i32
    %c0_i32_1 = arith.constant 0 : i32
    return %c0_i32, %c0_i32_0 : i32, i32
  }
  func.func @transform_6(%arg0: i32) -> (i32, i32) {
    %c0_i32 = arith.constant 0 : i32
    %c0_i32_0 = arith.constant 0 : i32
    %c0_i32_1 = arith.constant 0 : i32
    return %c0_i32, %c0_i32_0 : i32, i32
  }
  func.func @transform_7(%arg0: i32) -> (i32, i32) {
    %c0_i32 = arith.constant 0 : i32
    %c0_i32_0 = arith.constant 0 : i32
    %c0_i32_1 = arith.constant 0 : i32
    return %c0_i32, %c0_i32_0 : i32, i32
  }
  func.func @transform_8(%arg0: i32) -> (i32, i32) {
    %c0_i32 = arith.constant 0 : i32
    %c0_i32_0 = arith.constant 0 : i32
    %c0_i32_1 = arith.constant 0 : i32
    return %c0_i32, %c0_i32_0 : i32, i32
  }
  func.func @transform_9(%arg0: i32) -> (i32, i32) {
    %c0_i32 = arith.constant 0 : i32
    %c0_i32_0 = arith.constant 0 : i32
    return %arg0, %c0_i32 : i32, i32
  }
}

</mosaic_0001>

<bundles_post_ra>
// kernel: tpu_custom_call.1
= control target key start
LH: loop header
LB: loop body
LE: loop exit
PB: predicated region body
PF: predicated region fallthrough
CT: control target
= control target key end

     0   :  { %s2243_s0 = inlined_call_operand.hbm [shape: f32[32,32], index: 0, kind: input, shape index: {}]   ;;  %s2244_s1 = inlined_call_operand.hbm [shape: bf16[32,32], index: 1, kind: input, shape index: {}]   ;;  %s2245_s2 = inlined_call_operand.vmem [shape: f32[1,32], index: 2, kind: input, shape index: {}]   ;;  %s2246_s3 = inlined_call_operand.hbm [shape: bf16[32,32], index: 3, kind: input, shape index: {}]   ;;  %s2247_s4 = inlined_call_operand.vmem [shape: f32[1,32], index: 4, kind: input, shape index: {}]   ;;  %s2248_s5 = inlined_call_operand.vmem [shape: bf16[32,32], index: 5, kind: input, shape index: {}]   ;;  %s2249_s6 = inlined_call_operand.vmem [shape: f32[1,32], index: 6, kind: input, shape index: {}]   ;;  %s2250_s7 = inlined_call_operand.hbm [shape: bf16[32,32], index: 7, kind: input, shape index: {}]   ;;  %s2251_s8 = inlined_call_operand.vmem [shape: f32[1,32], index: 8, kind: input, shape index: {}]   ;;  %s2252_s9 = inlined_call_operand.hbm [shape: f32[32,32], index: 9, kind: output, shape index: {}]  }
   0x1   :  { %2259 = sst [smem:[#allocation21_spill]] %s2252_s9 }
   0x2   :  { %14 = vsyncpa [#allocation7], 0 }
   0x3   :  { %16 = vsyncpa [#allocation7 + $0x1], 0 }
   0x4   :  { %17 = vsyncpa [#allocation10], 0 }
   0x5   :  { %18 = vsyncpa [#allocation13], 0 }
   0x6   :  { %19 = vsyncpa [#allocation8], 0 }
   0x7   :  { %21 = vsyncpa [#allocation8 + $0x1], 0  ;;  %s1854_s30 = smov 0   ;;  %s1856_s10 = smov 0  }
   0x8   :  { %s1858_s11 = smov 0   ;;  %s1860_s12 = smov 0  }
   0x9 LB: > { %2260 = sst [smem:[#allocation19_spill]] %s1772_s30  ;;  %s1875_s13 = sadd.s32 4294967295, %s1784_s12   ;;  %s1784_s12 = sphi %s1860_s12, %s2285_s12   ;;  %s1780_s11 = sphi %s1858_s11, %s2284_s11   ;;  %s1776_s10 = sphi %s1856_s10, %s2283_s10   ;;  %s1772_s30 = sphi %s1854_s30, %s2282_s30  }
   0xa   : > { %s1312_s14 = sadd.s32 4294967294, %s1784_s12   ;;  %p47_p0 = scmp.ne.s32.totalorder %s1776_s10, %s1772_s30 }
   0xb   : > { %p2253_p1 = scmp.eq.s32.totalorder %s1875_s13, 0  ;;  %p245_p3 = scmp.eq.s32.totalorder %s1312_s14, 1 }
   0xc   : > { %p1313_p5 = scmp.ge.s32.totalorder %s1784_s12, 1  ;;  %p252_p7 = scmp.lt.s32.totalorder %s1784_s12, 3 }
   0xd   : > { %p1884_p4 = por %p2253_p1, %p47_p0  ;;  %p1889_p6 = por %p245_p3, %p47_p0 }
   0xe   : > { %p1894_p8 = pnand %p1313_p5, %p252_p7  ;;  %s1786_s18 = smov [#allocation9]  }
   0xf   : > { %s2261_s15 = scalar_select %p1884_p4, 1, 0 }
  0x10   : > { %s2262_s16 = scalar_select %p1889_p6, 1, 0 }
  0x11   : > { %s2264_s17 = scalar_select %p1894_p8, 1, 0 }
  0x12   : > { %2263 = sst [smem:[#allocation20_spill]] %s2262_s16  ;;  %s264_s19 = sshll.u32 %s1786_s18, 4  ;;  %s1898_s19 = int_to_ptr.vmem [resolvable:$true] %s264_s19 }
  0x13   : > { %p1482_p9 = pneg %p1894_p8  ;;  %s1787_s21 = smov [#allocation11]  }
  0x14   : > { %s280_s22 = sshll.u32 %s1787_s21, 4  ;;  %s1788_s23 = smov [#allocation12]   ;;  %s1909_s22 = int_to_ptr.vmem [resolvable:$true] %s280_s22 }
  0x15   : > { %p1905_p11 = pnand %p1482_p9, %p2253_p1  ;;  %s1911_s24 = sshll.u32 %s1788_s23, 4  ;;  %s303_s24 = int_to_ptr.vmem [resolvable:$true] %s1911_s24 }
  0x16   : > { %s1596_s27 = scalar_lea.hbm %s2244_s1, 256 }
  0x17   : > { %p1597_p12 = scmp.ne.s32.totalorder %s2244_s1, %s1596_s27  ;;  %p1921_p13 = pneg %p1905_p11 }
  0x18   : > { %p1603_p5 = scmp.lt.u32.totalorder %s1596_s27, %s2244_s1 }
  0x19   : > { %p1599_p0 = pnand %p1921_p13, %p1597_p12 }
  0x1b   : > { %p1600_p3 = pneg %p1599_p0 }
  0x1d   : > { %p1605_p7 = pnand %p1603_p5, %p1600_p3 }
  0x1f   : > { %1608 = shalt.err (!%p1605_p7)
}
  0x20   : > { %s1609_s23 = scalar_lea.vmem %s1898_s19, 256  ;;  %p1617_p2 = scmp.lt.s32.totalorder %s1898_s19, %s1898_s19 }
  0x21   : > { %p1610_p9 = scmp.ne.s32.totalorder %s1898_s19, %s1609_s23  ;;  %p1618_p6 = scmp.lt.s32.totalorder %s1609_s23, %s1609_s23 }
  0x23   : > { %p1612_p10 = pnand %p1610_p9, %p1921_p13  ;;  %p1619_p12 = por %p1618_p6, %p1617_p2 }
  0x25   : > { %p1613_p1 = pneg %p1612_p10 }
  0x27   : > { %p1620_p0 = pnand %p1619_p12, %p1613_p1 }
  0x29   : > { %1623 = shalt.err (!%p1620_p0)
}
  0x2a   : > { %s1789_s25 = smov 64   ;;  %s1790_s26 = smov 4  }
  0x2b   : > { %1485 = dma.hbm_to_vmem [thread:$0]  (!%p1905_p11), %s2244_s1, 256, %s1898_s19, [#allocation10], %s1789_s25, %s1789_s25, %s1790_s26  }
  0x2c   : > { %s1624_s21 = scalar_lea.hbm %s2246_s3, 256 }
  0x2d   : > { %p1625_p1 = scmp.ne.s32.totalorder %s2246_s3, %s1624_s21  ;;  %p1631_p10 = scmp.lt.u32.totalorder %s1624_s21, %s2246_s3 }
  0x2f   : > { %p1627_p2 = pnand %p1625_p1, %p1921_p13 }
  0x31   : > { %p1628_p6 = pneg %p1627_p2 }
  0x33   : > { %p1633_p3 = pnand %p1631_p10, %p1628_p6 }
  0x35   : > { %1636 = shalt.err (!%p1633_p3)
}
  0x36   : > { %s1637_s19 = scalar_lea.vmem %s1909_s22, 256  ;;  %p1645_p12 = scmp.lt.s32.totalorder %s1909_s22, %s1909_s22 }
  0x37   : > { %p1638_p5 = scmp.ne.s32.totalorder %s1909_s22, %s1637_s19  ;;  %p1646_p0 = scmp.lt.s32.totalorder %s1637_s19, %s1637_s19 }
  0x39   : > { %p1640_p7 = pnand %p1638_p5, %p1921_p13  ;;  %p1647_p1 = por %p1646_p0, %p1645_p12 }
  0x3b   : > { %p1641_p9 = pneg %p1640_p7 }
  0x3d   : > { %p1648_p2 = pnand %p1647_p1, %p1641_p9 }
  0x3f   : > { %1651 = shalt.err (!%p1648_p2)
}
  0x40   : > { %1488 = dma.hbm_to_vmem [thread:$0]  (!%p1905_p11), %s2246_s3, 256, %s1909_s22, [#allocation10], %s1789_s25, %s1789_s25, %s1790_s26  }
  0x41   : > { %s1652_s28 = scalar_lea.hbm %s2250_s7, 256 }
  0x42   : > { %p1653_p6 = scmp.ne.s32.totalorder %s2250_s7, %s1652_s28  ;;  %p1659_p5 = scmp.lt.u32.totalorder %s1652_s28, %s2250_s7 }
  0x44   : > { %p1655_p10 = pnand %p1653_p6, %p1921_p13 }
  0x46   : > { %p1656_p3 = pneg %p1655_p10 }
  0x48   : > { %p1661_p7 = pnand %p1659_p5, %p1656_p3 }
  0x4a   : > { %1664 = shalt.err (!%p1661_p7)
}
  0x4b   : > { %s1665_s19 = scalar_lea.vmem %s303_s24, 256  ;;  %p1673_p1 = scmp.lt.s32.totalorder %s303_s24, %s303_s24 }
  0x4c   : > { %p1666_p9 = scmp.ne.s32.totalorder %s303_s24, %s1665_s19  ;;  %p1674_p2 = scmp.lt.s32.totalorder %s1665_s19, %s1665_s19 }
  0x4e   : > { %p1668_p12 = pnand %p1666_p9, %p1921_p13  ;;  %p1675_p4 = por %p1674_p2, %p1673_p1 }
  0x50   : > { %p1669_p0 = pneg %p1668_p12 }
  0x52   : > { %p1676_p8 = pnand %p1675_p4, %p1669_p0 }
  0x54   : > { %1679 = shalt.err (!%p1676_p8)
}
  0x55   : > { %1491 = dma.hbm_to_vmem [thread:$0]  (!%p1905_p11), %s2250_s7, 256, %s303_s24, [#allocation13], %s1789_s25, %s1789_s25, %s1790_s26  }
  0x56   : > { %s1994_s14 = sadd.s32 1, %s1784_s12   ;;  %s34_s30 = sadd.s32 1, %s1780_s11 }
  0x57   : > { %s31_s20 = ssub.s32 %s1784_s12, %s1994_s14  ;;  %p41_p8 = scmp.ne.s32.totalorder %s1780_s11, %s1776_s10 }
  0x58   : > { %p32_p4 = scmp.eq.s32.totalorder %s31_s20, 0  ;;  %p42_p13 = scmp.eq.s32.totalorder %s1784_s12, 0 }
  0x59   : > { %p1503_p6 = scmp.lt.s32.totalorder %s1784_s12, 2  ;;  %p2267_p3 = scmp.eq.s32.totalorder %s1875_s13, 1 }
  0x5a   : > { %s2004_s16 = scalar_select %p32_p4, %s1780_s11, %s34_s30  }
  0x5b   : > { %p43_p10 = por %p42_p13, %p41_p8  ;;  %p2008_p5 = por %p2267_p3, %p41_p8 }
  0x5c   : > { %s319_s28 = sand.u32 1, %s1780_s11   ;;  %s1356_s29 = sshll.u32 %s1784_s12, 8 }
  0x5d   : > { %s1318_s24 = sshll.u32 %s319_s28, 4  ;;  %s2017_s18 = scalar_lea.hbm %s2243_s0, %s1356_s29 }
  0x5e   : > { %s323_s21 = scalar_lea.vmem [#allocation6], %s1318_s24  ;;  %p2019_p11 = pnand %p1503_p6, %p43_p10 }
  0x5f   : > { %s330_s23 = sshll.u32 %s323_s21, 4  ;;  %s2025_s22 = scalar_lea.sflag [#allocation7], %s319_s28  ;;  %s2023_s23 = int_to_ptr.vmem [resolvable:$true] %s330_s23 }
  0x60   : > { %s1680_s9 = scalar_lea.hbm %s2017_s18, 256  ;;  %p1682_p9 = pneg %p2019_p11 }
  0x61   : > { %p1681_p7 = scmp.ne.s32.totalorder %s2017_s18, %s1680_s9  ;;  %s1685_s29 = scalar_lea.hbm %s2243_s0, 512 }
  0x62   : > { %p1686_p1 = scmp.lt.u32.totalorder %s2017_s18, %s2243_s0  ;;  %p1687_p2 = scmp.lt.u32.totalorder %s1685_s29, %s1680_s9 }
  0x63   : > { %p1683_p12 = pnand %p1682_p9, %p1681_p7  ;;  %p1689_p8 = scmp.lt.u32.totalorder %s1680_s9, %s2017_s18 }
  0x64   : > { %p1688_p4 = por %p1687_p2, %p1686_p1 }
  0x65   : > { %p1684_p0 = pneg %p1683_p12 }
  0x66   : > { %p1690_p13 = por %p1689_p8, %p1688_p4 }
  0x68   : > { %p1691_p6 = pnand %p1690_p13, %p1684_p0 }
  0x6a   : > { %1694 = shalt.err (!%p1691_p6)
}
  0x6b   : > { %s1695_s28 = scalar_lea.vmem %s2023_s23, 256  ;;  %s1791_s26 = smov [#allocation6]  }
  0x6c   : > { %p1696_p10 = scmp.ne.s32.totalorder %s2023_s23, %s1695_s28  ;;  %s1700_s21 = sshll.u32 %s1791_s26, 4  ;;  %s1701_s21 = int_to_ptr.vmem [resolvable:$false] %s1700_s21 }
  0x6d   : > { %s1702_s20 = scalar_lea.vmem %s1701_s21, 512  ;;  %p1703_p12 = scmp.lt.s32.totalorder %s2023_s23, %s1701_s21 }
  0x6e   : > { %p1698_p3 = pnand %p1696_p10, %p1682_p9  ;;  %p1704_p1 = scmp.lt.s32.totalorder %s1702_s20, %s1695_s28 }
  0x70   : > { %p1699_p7 = pneg %p1698_p3  ;;  %p1705_p2 = por %p1704_p1, %p1703_p12 }
  0x72   : > { %p1706_p4 = pnand %p1705_p2, %p1699_p7 }
  0x74   : > { %1709 = shalt.err (!%p1706_p4)
}
  0x75   : > { %s1792_s9 = smov 128   ;;  %s1793_s30 = smov 8  }
  0x76   : > { %1495 = dma.hbm_to_vmem [thread:$0]  (!%p2019_p11), %s2017_s18, 256, %s2023_s23, %s2025_s22, %s1792_s9, %s1792_s9, %s1793_s30  }
  0x77   : > { %p2270_p9 = scmp.ne.s32.totalorder %s2264_s17, 0 }
  0x78   : > { %s2056_s29 = sand.u32 (!%p2270_p9), 1, %s1776_s10   ;;  %p2271_p0 = scmp.ne.s32.totalorder (!%p2270_p9), %s2261_s15, 0 }
  0x79   : > { %342 = sbr.rel (%p2270_p9) target bundleno = 1459 (0x5b3), region = 56  ;;  %s1322_s24 = sshll.u32 (!%p2270_p9), %s2056_s29, 4 }
  0x7a   : > { %s345_s25 = scalar_lea.sflag (!%p2270_p9), [#allocation7], %s2056_s29  ;;  %s348_s28 = scalar_lea.vmem (!%p2270_p9), [#allocation6], %s1322_s24 }
  0x80   : > { %1755 = dma.done.wait (%p2271_p0), %s345_s25, 256  }
  0x81   : > { %1757 = vsyncadd (%p2271_p0), %s345_s25, 4294967040  ;;  %p2272_p11 = scmp.eq.s32.totalorder %s1875_s13, 0 }
  0x83   : > { %1759 = dma.done.wait (%p2272_p11), [#allocation10], 512   ;;  %p2273_p8 = pmov %p2272_p11 }
  0x85   : > { %1761 = vsyncadd (%p2273_p8), [#allocation10], 4294966784  ;;  %p2274_p13 = pmov %p2273_p8 }
  0x86   : > { %p2275_p6 = pmov %p2273_p8 }
  0x87   : > { %1763 = dma.done.wait (%p2274_p13), [#allocation13], 256  }
  0x88   : > { %1765 = vsyncadd (%p2275_p6), [#allocation13], 4294967040  ;;  %v1794_v0 = vmov 0.0   ;;  %vm1795_vm0 = vmmov 0   ;;  %v1556_v1 = vld [vmem:[#allocation11] sm:$0xff]   ;;  %v1557_v2 = vld [vmem:[#allocation9] sm:$0xff]  }
  0x89   : > { %1394 = vmatprep.subr.bf16.mxu1 %v1794_v0  ;;  %1386 = vmatprep.subr.bf16.mxu0 %v1794_v0  ;;  %v1558_v3 = vld [vmem:[#allocation11 + $0x8] sm:$0xff]   ;;  %v398_v4 = vld [vmem:[%s348_s28] sm:$0xff]  ;;  %vm424_vm1 = vcmask 261120   ;;  %v1559_v6 = vld [vmem:[#allocation9 + $0x8] sm:$0xff]   ;;  %vm606_vm2 = vcmask 64512   ;;  %s1796_s20 = smov 112  }
  0x8a   : > { %1398 = vmatprep.mubr.msk.bf16.mxu1 %vm1795_vm0, %v1794_v0  ;;  %1390 = vmatprep.mubr.msk.bf16.mxu0 %vm1795_vm0, %v1794_v0  ;;  %v399_v5 = vld [vmem:[%s348_s28 + $0x8] sm:$0xff]  ;;  %v1560_v8 = vld [vmem:[%s2248_s5] sm:$0xff]   ;;  %s1797_s9 = smov 120   ;;  %s1798_s30 = smov 104   ;;  %vm654_vm3 = vcmask 130048   ;;  %vm856_vm4 = vcmask 130112  }
  0x8b   : > { %1395 = vmatpush3.bf16.msra.mxu1 %v1556_v1  ;;  %1387 = vmatpush3.bf16.msra.mxu0 %v1557_v2  ;;  %v400_v7 = vpack.c.bf16 %v399_v5, %v398_v4  ;;  %v1561_v9 = vld [vmem:[%s2248_s5 + $0x8] sm:$0xff]   ;;  %v1327_v10 = vld [vmem:[%s2245_s2] ss:$0 sm:$0xff]  ;;  %s1799_s15 = smov 8   ;;  %s1800_s17 = smov 16   ;;  %vm990_vm5 = vcmask 195712  }
  0x8c   : > { %1396 = vmatprep.subr.bf16.mxu1 %v1794_v0  ;;  %1388 = vmatprep.subr.bf16.mxu0 %v1794_v0  ;;  %v1331_v11 = vld [vmem:[%s2247_s4] ss:$0 sm:$0xff]  ;;  %s1801_s18 = smov 24   ;;  %vm1124_vm6 = vcmask 261312   ;;  %s394_s22 = scalar_lea.vmem [#allocation14], %s1322_s24 }
  0x8d   : > { %v1335_v29 = vld [vmem:[%s2249_s6] ss:$0 sm:$0xff]  ;;  %s1210_s26 = sshll.u32 %s394_s22, 4  ;;  %s1357_s21 = sshll.u32 %s1875_s13, 8  ;;  %s2191_s26 = int_to_ptr.vmem [resolvable:$true] %s1210_s26 }
  0x8e   : > { %s1197_s13 = scalar_lea.sflag [#allocation8], %s2056_s29  ;;  %s1710_s28 = scalar_lea.vmem %s2191_s26, 256 }
  0x8f   : > { %1397 = vmatpush3.bf16.msra.mxu1 %v1558_v3  ;;  %1389 = vmatpush3.bf16.msra.mxu0 %v1559_v6  ;;  %p1711_p10 = scmp.ne.s32.totalorder %s2191_s26, %s1710_s28 }
  0x90   : > { %1410 = vmatprep.subr.bf16.mxu1 %v1794_v0  ;;  %1402 = vmatprep.subr.bf16.mxu0 %v1794_v0 }
  0x91   : > { %p1712_p3 = pnand %p1711_p10, %p2008_p5 }
  0x92   : > { %1399 = vmatmul.mubr.msk.bf16.vlgmr.msra.gmra.mrb[0].mxu1 %vm424_vm1, %v400_v7  ;;  %1391 = vmatmul.mubr.msk.bf16.vlgmr.msra.gmra.mrb[0].mxu0 %vm424_vm1, %v400_v7 }
  0x93   : > { %1412 = vmatprep.mubr.msk.bf16.mxu1 %vm1795_vm0, %v1794_v0  ;;  %1406 = vmatprep.mubr.msk.bf16.mxu0 %vm1795_vm0, %v1794_v0  ;;  %p1713_p7 = pneg %p1712_p3 }
  0x94   : > { %1403 = vmatpush3.bf16.msra.mxu0 %v1560_v8 }
  0x95   : > { %1404 = vmatprep.subr.bf16.mxu0 %v1794_v0 }
  0x98   : > { %1405 = vmatpush3.bf16.msra.mxu0 %v1561_v9 }
  0x99   : > { %1416 = vmatprep.subr.bf16.mxu0 %v1794_v0 }
  0x9b   : > { %1407 = vmatmul.mubr.msk.bf16.vlgmr.msra.gmra.mrb[4].mxu0 %vm424_vm1, %v400_v7 }
  0x9c   : > { %1418 = vmatprep.mubr.msk.bf16.mxu0 %vm1795_vm0, %v1794_v0 }
 0x165   : > { %v528_v12 = vpop.f32.mrb[0].mxu1  ;;  %v462_v14 = vpop.f32.mrb[0].mxu0 }
 0x166   : > { %v1400_v13 = vpop.f32.mrb[1].mxu1  ;;  %v463_v16 = vadd.f32 %v1327_v10, %v462_v14  ;;  %v1392_v17 = vpop.f32.mrb[1].mxu0  ;;  %v529_v18 = vadd.f32 %v1331_v11, %v528_v12 }
 0x167   : > { %v531_v15 = vpop.f32.mrb[2].mxu1  ;;  %v465_v21 = vpop.f32.mrb[2].mxu0 }
 0x168   : > { %v532_v19 = vadd.f32 %v1331_v11, %v531_v15  ;;  %v1401_v20 = vpop.f32.mrb[3].mxu1  ;;  %v466_v22 = vadd.f32 %v1327_v10, %v465_v21  ;;  %v1393_v23 = vpop.f32.mrb[3].mxu0 }
 0x16a   : > { %v535_v24 = vpack.c.bf16 %v532_v19, %v529_v18  ;;  %v469_v25 = vpack.c.bf16 %v466_v22, %v463_v16 }
 0x16c   : > { %536 = vst.msk [vmem:[#allocation3] sm:$0xff] %vm424_vm1, %v535_v24  ;;  %470 = vst.msk [vmem:[#allocation2] sm:$0xff] %vm424_vm1, %v469_v25 }
 0x16e   : > { %v594_v30 = vpop.f32.mrb[4].mxu0 }
 0x16f   : > { %v595_v31 = vadd.f32 %v1335_v29, %v594_v30  ;;  %v1408_v32 = vpop.f32.mrb[5].mxu0 }
 0x170   : > { %v597_v33 = vpop.f32.mrb[6].mxu0 }
 0x171   : > { %v598_v34 = vadd.f32 %v1335_v29, %v597_v33  ;;  %v1409_v35 = vpop.f32.mrb[7].mxu0 }
 0x173   : > { %v859_v26 = vld [vmem:[#allocation3] sm:$0xff]  ;;  %v858_v28 = vld [vmem:[#allocation2] sm:$0xff]  ;;  %v601_v36 = vpack.c.bf16 %v598_v34, %v595_v31 }
 0x174   : > { %865 = vrot.lane.b32.xlu1 %v859_v26, %s1796_s20  ;;  %731 = vrot.lane.b32.xlu0 %v859_v26, %s1797_s9  ;;  %v611_v27 = vsel %vm606_vm2, %v859_v26, 0 }
 0x175   : > { %1411 = vmatpush3.bf16.xpose.msra.mxu1 %v611_v27  ;;  %602 = vst.msk [vmem:[#allocation4] sm:$0xff] %vm424_vm1, %v601_v36 }
 0x176   : > { %1422 = vmatprep.subr.bf16.mxu1 %v1794_v0 }
 0x178   : > { %862 = vrot.lane.b32.xlu1 %v858_v28, %s1796_s20  ;;  %728 = vrot.lane.b32.xlu0 %v858_v28, %s1797_s9 }
 0x17c   : > { %996 = vrot.lane.b32.xlu1 %v858_v28, %s1798_s30  ;;  %999 = vrot.lane.b32.xlu0 %v859_v26, %s1798_s30  ;;  %v2125_v39 = vld [vmem:[#allocation4] sm:$0xff] }
 0x17d   : > { %1413 = vmatmul.mubr.msk.bf16.vlgmr.msra.gmra.mrb[4].mxu1 %vm606_vm2, %v858_v28  ;;  %1417 = vmatpush3.bf16.msra.mxu0 %v2125_v39 }
 0x17e   : > { %1424 = vmatprep.mubr.msk.bf16.mxu1 %vm1795_vm0, %v1794_v0  ;;  %1428 = vmatprep.subr.bf16.mxu0 %v1794_v0 }
 0x1e6   : > { %v732_v37 = vpop.permute.xlu0 %731  ;;  %v866_v40 = vpop.permute.xlu1 %865 }
 0x1e7   : > { %v737_v38 = vsel %vm606_vm2, %v732_v37, 0  ;;  %v871_v42 = vsel %vm606_vm2, %v866_v40, 0 }
 0x1e8   : > { %1423 = vmatpush3.bf16.xpose.msra.mxu1 %v737_v38 }
 0x1e9   : > { %1434 = vmatprep.subr.bf16.mxu1 %v1794_v0 }
 0x1ea   : > { %v729_v41 = vpop.permute.xlu0 %728  ;;  %v863_v44 = vpop.permute.xlu1 %862 }
 0x1ee   : > { %v1000_v43 = vpop.permute.xlu0 %999  ;;  %v997_v46 = vpop.permute.xlu1 %996 }
 0x1ef   : > { %1425 = vmatmul.mubr.msk.bf16.vlgmr.msra.gmra.mrb[8].mxu1 %vm606_vm2, %v729_v41  ;;  %v1005_v45 = vsel %vm606_vm2, %v1000_v43, 0 }
 0x1f0   : > { %1435 = vmatpush3.bf16.xpose.msra.mxu1 %v871_v42  ;;  %1436 = vmatprep.mubr.msk.bf16.mxu1 %vm1795_vm0, %v1794_v0 }
 0x1f1   : > { %1446 = vmatprep.subr.bf16.mxu1 %v1794_v0 }
 0x1f7   : > { %1437 = vmatmul.mubr.msk.bf16.vlgmr.msra.gmra.mrb[12].mxu1 %vm606_vm2, %v863_v44 }
 0x1f8   : > { %1447 = vmatpush3.bf16.xpose.msra.mxu1 %v1005_v45  ;;  %1448 = vmatprep.mubr.msk.bf16.mxu1 %vm1795_vm0, %v1794_v0 }
 0x1f9   : > { %1458 = vmatprep.subr.bf16.mxu1 %v1794_v0 }
 0x1ff   : > { %1449 = vmatmul.mubr.msk.bf16.vlgmr.msra.gmra.mrb[16].mxu1 %vm606_vm2, %v997_v46 }
 0x200   : > { %1462 = vmatprep.mubr.msk.bf16.mxu1 %vm1795_vm0, %v1794_v0 }
 0x250   : > { %v647_v47 = vpop.f32.mrb[4].mxu1 }
 0x251   : > { %v1414_v48 = vpop.f32.mrb[5].mxu1  ;;  %v655_v49 = vsel %vm654_vm3, %v647_v47, -inf }
 0x252   : > { %656 = vmax.xlane.f32.xlu0 %v655_v49  ;;  %v650_v50 = vpop.f32.mrb[6].mxu1 }
 0x253   : > { %v1415_v51 = vpop.f32.mrb[7].mxu1  ;;  %v658_v52 = vsel %vm654_vm3, %v650_v50, -inf }
 0x254   : > { %659 = vmax.xlane.f32.xlu1 %v658_v52 }
 0x265   : > { %800 = vrot.lane.b32.xlu1 %v2125_v39, %s1797_s9 }
 0x2c2   : > { %v773_v53 = vpop.f32.mrb[8].mxu1 }
 0x2c3   : > { %v1426_v54 = vpop.f32.mrb[9].mxu1  ;;  %v780_v55 = vsel %vm654_vm3, %v773_v53, -inf }
 0x2c4   : > { %781 = vmax.xlane.f32.xlu0 %v780_v55  ;;  %v776_v56 = vpop.f32.mrb[10].mxu1 }
 0x2c5   : > { %v1427_v57 = vpop.f32.mrb[11].mxu1  ;;  %v783_v58 = vsel %vm654_vm3, %v776_v56, -inf }
 0x2c8   : > { %784 = vmax.xlane.f32.xlu0 %v783_v58 }
 0x2ca   : > { %v907_v59 = vpop.f32.mrb[12].mxu1 }
 0x2cb   : > { %v1438_v60 = vpop.f32.mrb[13].mxu1  ;;  %v914_v61 = vsel %vm654_vm3, %v907_v59, -inf }
 0x2cc   : > { %v910_v62 = vpop.f32.mrb[14].mxu1  ;;  %915 = vmax.xlane.f32.xlu1 %v914_v61 }
 0x2cd   : > { %v1439_v63 = vpop.f32.mrb[15].mxu1  ;;  %v917_v1 = vsel %vm654_vm3, %v910_v62, -inf }
 0x2ce   : > { %918 = vmax.xlane.f32.xlu0 %v917_v1 }
 0x2d2   : > { %v1041_v2 = vpop.f32.mrb[16].mxu1 }
 0x2d3   : > { %v1450_v3 = vpop.f32.mrb[17].mxu1  ;;  %v1048_v4 = vsel %vm654_vm3, %v1041_v2, -inf }
 0x2d4   : > { %v1044_v5 = vpop.f32.mrb[18].mxu1  ;;  %1049 = vmax.xlane.f32.xlu1 %v1048_v4 }
 0x2d5   : > { %v1451_v6 = vpop.f32.mrb[19].mxu1  ;;  %v1051_v7 = vsel %vm654_vm3, %v1044_v5, -inf }
 0x2d6   : > { %1052 = vmax.xlane.f32.xlu0 %v1051_v7 }
 0x2df   : > { %v657_v8 = vpop.xlane.xlu0 %656 }
 0x2e0   : > { %v661_v9 = vsub.f32 %v647_v47, %v657_v8 }
 0x2e1   : > { %v660_v10 = vpop.xlane.xlu1 %659 }
 0x2e2   : > { %v663_v11 = vmul.f32 1.442695, %v661_v9  ;;  %v662_v12 = vsub.f32 %v650_v50, %v660_v10 }
 0x2e4   : > { %v665_v13 = vmul.f32 1.442695, %v662_v12  ;;  %1564 = vpow2.f32 %v663_v11 }
 0x2e5   : > { %1068 = vrot.lane.b32.xlu1 %v2125_v39, %s1798_s30  ;;  %v801_v17 = vpop.permute.xlu1 %800  ;;  %s2276_s30 = sld [smem:[#allocation21_spill]] }
 0x2e6   : > { %1566 = vpow2.f32 %v665_v13 }
 0x2eb   : > { %s2277_s25 = smov %s2276_s30  ;;  %s2197_s24 = scalar_lea.hbm %s2276_s30, %s1357_s21 }
 0x2ec   : > { %934 = vrot.lane.b32.xlu0 %v2125_v39, %s1796_s20 }
 0x2ee   : > { %v1565_v14 = vpop.eup %1564 }
 0x2f0   : > { %v2157_v15 = vpop.eup %1566 }
 0x2f1   : > { %v673_v16 = vpack.c.bf16 %v2157_v15, %v1565_v14  ;;  %v670_v54 = vsel %vm654_vm3, %v2157_v15, 0.0 }
 0x2f3   : > { %1419 = vmatmul.mubr.msk.bf16.vlgmr.msra.gmra.mrb[8].mxu0 %vm654_vm3, %v673_v16 }
 0x2f4   : > { %1429 = vmatpush3.bf16.msra.mxu0 %v801_v17  ;;  %1430 = vmatprep.mubr.msk.bf16.mxu0 %vm1795_vm0, %v1794_v0 }
 0x2f5   : > { %1440 = vmatprep.subr.bf16.mxu0 %v1794_v0 }
 0x351   : > { %v782_v18 = vpop.xlane.xlu0 %781 }
 0x352   : > { %v786_v19 = vsub.f32 %v773_v53, %v782_v18  ;;  %v667_v53 = vsel %vm654_vm3, %v1565_v14, 0.0 }
 0x354   : > { %v788_v20 = vmul.f32 1.442695, %v786_v19 }
 0x355   : > { %v785_v21 = vpop.xlane.xlu0 %784 }
 0x356   : > { %1568 = vpow2.f32 %v788_v20  ;;  %v787_v22 = vsub.f32 %v776_v56, %v785_v21 }
 0x358   : > { %v790_v23 = vmul.f32 1.442695, %v787_v22 }
 0x359   : > { %v916_v24 = vpop.xlane.xlu1 %915 }
 0x35a   : > { %1570 = vpow2.f32 %v790_v23  ;;  %v920_v25 = vsub.f32 %v907_v59, %v916_v24  ;;  %v1562_v23 = vld [vmem:[#allocation12] sm:$0xff]  }
 0x35b   : > { %v919_v26 = vpop.xlane.xlu0 %918  ;;  %1459 = vmatpush3.bf16.msra.mxu1 %v1562_v23 }
 0x35c   : > { %v922_v27 = vmul.f32 1.442695, %v920_v25  ;;  %v921_v28 = vsub.f32 %v910_v62, %v919_v26  ;;  %1460 = vmatprep.subr.bf16.mxu1 %v1794_v0 }
 0x35e   : > { %1572 = vpow2.f32 %v922_v27  ;;  %v924_v29 = vmul.f32 1.442695, %v921_v28  ;;  %v1563_v27 = vld [vmem:[#allocation12 + $0x8] sm:$0xff]  }
 0x35f   : > { %1461 = vmatpush3.bf16.msra.mxu1 %v1563_v27 }
 0x360   : > { %v1569_v30 = vpop.eup %1568  ;;  %1574 = vpow2.f32 %v924_v29 }
 0x361   : > { %v1050_v31 = vpop.xlane.xlu1 %1049  ;;  %v792_v32 = vsel %vm654_vm3, %v1569_v30, 0.0 }
 0x362   : > { %v1054_v33 = vsub.f32 %v1041_v2, %v1050_v31  ;;  %793 = vadd.xlane.f32.xlu1 %v792_v32 }
 0x363   : > { %v1053_v34 = vpop.xlane.xlu0 %1052 }
 0x364   : > { %v1571_v35 = vpop.eup %1570  ;;  %v1056_v36 = vmul.f32 1.442695, %v1054_v33  ;;  %v1055_v37 = vsub.f32 %v1044_v5, %v1053_v34 }
 0x365   : > { %v795_v38 = vsel %vm654_vm3, %v1571_v35, 0.0  ;;  %v798_v39 = vpack.c.bf16 %v1571_v35, %v1569_v30  ;;  %v1069_v47 = vpop.permute.xlu1 %1068 }
 0x366   : > { %1576 = vpow2.f32 %v1056_v36  ;;  %v1058_v40 = vmul.f32 1.442695, %v1055_v37  ;;  %796 = vadd.xlane.f32.xlu0 %v795_v38 }
 0x367   : > { %v935_v41 = vpop.permute.xlu0 %934  ;;  %1431 = vmatmul.mubr.msk.bf16.vlgmr.msra.gmra.mrb[12].mxu0 %vm654_vm3, %v798_v39 }
 0x368   : > { %v1573_v42 = vpop.eup %1572  ;;  %1578 = vpow2.f32 %v1058_v40  ;;  %1441 = vmatpush3.bf16.msra.mxu0 %v935_v41  ;;  %1442 = vmatprep.mubr.msk.bf16.mxu0 %vm1795_vm0, %v1794_v0  ;;  %v1347_v41 = vld [vmem:[%s2251_s8] ss:$0 sm:$0xff] }
 0x369   : > { %v926_v43 = vsel %vm654_vm3, %v1573_v42, 0.0  ;;  %1452 = vmatprep.subr.bf16.mxu0 %v1794_v0 }
 0x36a   : > { %v1575_v44 = vpop.eup %1574  ;;  %927 = vadd.xlane.f32.xlu0 %v926_v43 }
 0x36b   : > { %v929_v45 = vsel %vm654_vm3, %v1575_v44, 0.0  ;;  %v932_v46 = vpack.c.bf16 %v1575_v44, %v1573_v42 }
 0x36c   : > { %930 = vadd.xlane.f32.xlu1 %v929_v45 }
 0x36f   : > { %1443 = vmatmul.mubr.msk.bf16.vlgmr.msra.gmra.mrb[16].mxu0 %vm654_vm3, %v932_v46 }
 0x370   : > { %v1577_v48 = vpop.eup %1576  ;;  %1453 = vmatpush3.bf16.msra.mxu0 %v1069_v47  ;;  %1454 = vmatprep.mubr.msk.bf16.mxu0 %vm1795_vm0, %v1794_v0 }
 0x371   : > { %v1060_v49 = vsel %vm654_vm3, %v1577_v48, 0.0 }
 0x372   : > { %v1579_v50 = vpop.eup %1578  ;;  %1061 = vadd.xlane.f32.xlu0 %v1060_v49 }
 0x373   : > { %v1063_v51 = vsel %vm654_vm3, %v1579_v50, 0.0  ;;  %v1066_v52 = vpack.c.bf16 %v1579_v50, %v1577_v48 }
 0x374   : > { %1064 = vadd.xlane.f32.xlu1 %v1063_v51 }
 0x376   : > { %668 = vadd.xlane.f32.xlu0 %v667_v53 }
 0x377   : > { %1455 = vmatmul.mubr.msk.bf16.vlgmr.msra.gmra.mrb[20].mxu0 %vm654_vm3, %v1066_v52 }
 0x378   : > { %671 = vadd.xlane.f32.xlu1 %v670_v54 }
 0x3c6   : > { %v711_v55 = vpop.f32.mrb[8].mxu0 }
 0x3c7   : > { %v1420_v56 = vpop.f32.mrb[9].mxu0 }
 0x3c8   : > { %v714_v57 = vpop.f32.mrb[10].mxu0 }
 0x3c9   : > { %v1421_v58 = vpop.f32.mrb[11].mxu0 }
 0x3ef   : > { %v794_v60 = vpop.xlane.xlu1 %793 }
 0x3f3   : > { %v797_v59 = vpop.xlane.xlu0 %796 }
 0x3f7   : > { %v928_v61 = vpop.xlane.xlu0 %927 }
 0x3f9   : > { %v931_v62 = vpop.xlane.xlu1 %930 }
 0x3ff   : > { %v1062_v63 = vpop.xlane.xlu0 %1061 }
 0x401   : > { %v1065_v1 = vpop.xlane.xlu1 %1064 }
 0x403   : > { %v669_v2 = vpop.xlane.xlu0 %668 }
 0x404   : > { %1580 = vrcp.f32 %v669_v2 }
 0x405   : > { %v672_v3 = vpop.xlane.xlu1 %671 }
 0x406   : > { %1582 = vrcp.f32 %v672_v3 }
 0x407   : > { %1584 = vrcp.f32 %v794_v60 }
 0x408   : > { %1586 = vrcp.f32 %v797_v59 }
 0x409   : > { %1588 = vrcp.f32 %v928_v61 }
 0x40a   : > { %1590 = vrcp.f32 %v931_v62 }
 0x40b   : > { %1592 = vrcp.f32 %v1062_v63 }
 0x40c   : > { %1594 = vrcp.f32 %v1065_v1 }
 0x40e   : > { %v1581_v4 = vpop.eup %1580 }
 0x40f   : > { %v720_v6 = vmul.f32 %v1581_v4, %v711_v55 }
 0x410   : > { %v1583_v5 = vpop.eup %1582 }
 0x411   : > { %v721_v7 = vmul.f32 %v1583_v5, %v714_v57  ;;  %v1585_v10 = vpop.eup %1584 }
 0x412   : > { %v1587_v12 = vpop.eup %1586 }
 0x413   : > { %v722_v8 = vpack.c.bf16 %v721_v7, %v720_v6  ;;  %v1589_v19 = vpop.eup %1588 }
 0x414   : > { %v1591_v21 = vpop.eup %1590 }
 0x415   : > { %723 = vst.msk [vmem:[#allocation5] sm:$0xff] %vm606_vm2, %v722_v8  ;;  %v1593_v29 = vpop.eup %1592 }
 0x416   : > { %v1595_v33 = vpop.eup %1594 }
 0x43a   : > { %v840_v9 = vpop.f32.mrb[12].mxu0 }
 0x43b   : > { %v1432_v11 = vpop.f32.mrb[13].mxu0  ;;  %v849_v14 = vmul.f32 %v1585_v10, %v840_v9 }
 0x43c   : > { %v843_v13 = vpop.f32.mrb[14].mxu0 }
 0x43d   : > { %v850_v15 = vmul.f32 %v1587_v12, %v843_v13  ;;  %v1433_v16 = vpop.f32.mrb[15].mxu0 }
 0x43f   : > { %v851_v17 = vpack.c.bf16 %v850_v15, %v849_v14 }
 0x441   : > { %853 = vrot.lane.b32.xlu0 %v851_v17, %s1799_s15 }
 0x442   : > { %v974_v18 = vpop.f32.mrb[16].mxu0 }
 0x443   : > { %v1444_v20 = vpop.f32.mrb[17].mxu0  ;;  %v983_v24 = vmul.f32 %v1589_v19, %v974_v18 }
 0x444   : > { %v977_v22 = vpop.f32.mrb[18].mxu0 }
 0x445   : > { %v984_v25 = vmul.f32 %v1591_v21, %v977_v22  ;;  %v1445_v26 = vpop.f32.mrb[19].mxu0 }
 0x447   : > { %v985_v28 = vpack.c.bf16 %v984_v25, %v983_v24 }
 0x449   : > { %987 = vrot.lane.b32.xlu1 %v985_v28, %s1800_s17  ;;  %s1802_s17 = smov [#allocation14]  }
 0x44a   : > { %v1108_v30 = vpop.f32.mrb[20].mxu0 }
 0x44b   : > { %v1117_v31 = vmul.f32 %v1593_v29, %v1108_v30  ;;  %v1456_v32 = vpop.f32.mrb[21].mxu0 }
 0x44c   : > { %v1111_v34 = vpop.f32.mrb[22].mxu0 }
 0x44d   : > { %v1118_v35 = vmul.f32 %v1595_v33, %v1111_v34  ;;  %v1457_v36 = vpop.f32.mrb[23].mxu0 }
 0x44f   : > { %v1119_v37 = vpack.c.bf16 %v1118_v35, %v1117_v31 }
 0x451   : > { %1121 = vrot.lane.b32.xlu1 %v1119_v37, %s1801_s18  ;;  %s1714_s18 = sshll.u32 %s1802_s17, 4  ;;  %s1715_s18 = int_to_ptr.vmem [resolvable:$false] %s1714_s18 }
 0x452   : > { %s1716_s23 = scalar_lea.vmem %s1715_s18, 512  ;;  %p1717_p12 = scmp.lt.s32.totalorder %s2191_s26, %s1715_s18 }
 0x453   : > { %p1718_p1 = scmp.lt.s32.totalorder %s1716_s23, %s1710_s28 }
 0x455   : > { %p1719_p2 = por %p1718_p1, %p1717_p12 }
 0x457   : > { %p1720_p4 = pnand %p1719_p2, %p1713_p7 }
 0x4b3   : > { %v854_v38 = vpop.permute.xlu0 %853 }
 0x4b4   : > { %857 = vst.msk [vmem:[#allocation5] sm:$0xff] %vm856_vm4, %v854_v38 }
 0x4bb   : > { %v988_v0 = vpop.permute.xlu1 %987 }
 0x4bc   : > { %991 = vst.msk [vmem:[#allocation5] sm:$0xff] %vm990_vm5, %v988_v0 }
 0x4c3   : > { %v1122_v39 = vpop.permute.xlu1 %1121 }
 0x4c4   : > { %1125 = vst.msk [vmem:[#allocation5] sm:$0xff] %vm1124_vm6, %v1122_v39 }
 0x4cb   : > { %v1126_v40 = vld [vmem:[#allocation5] sm:$0xff] }
 0x4cc   : > { %1463 = vmatmul.mubr.msk.bf16.vlgmr.msra.gmra.mrb[20].mxu1 %vm424_vm1, %v1126_v40 }
 0x59f   : > { %v1187_v42 = vpop.f32.mrb[20].mxu1 }
 0x5a0   : > { %v1188_v43 = vadd.f32 %v1347_v41, %v1187_v42  ;;  %v1464_v44 = vpop.f32.mrb[21].mxu1 }
 0x5a1   : > { %v1190_v45 = vpop.f32.mrb[22].mxu1 }
 0x5a2   : > { %1194 = vst.msk [vmem:[%s394_s22] sm:$0xff] %vm424_vm1, %v1188_v43  ;;  %v1191_v46 = vadd.f32 %v1347_v41, %v1190_v45  ;;  %v1465_v47 = vpop.f32.mrb[23].mxu1 }
 0x5a4   : > { %1195 = vst.msk [vmem:[%s394_s22 + $0x8] sm:$0xff] %vm424_vm1, %v1191_v46 }
 0x5a5   : > { %1723 = shalt.err (!%p1720_p4)
}
 0x5a6   : > { %s1724_s19 = scalar_lea.hbm %s2197_s24, 256  ;;  %s1728_s20 = scalar_lea.hbm %s2277_s25, 512 }
 0x5a7   : > { %p1725_p9 = scmp.ne.s32.totalorder %s2197_s24, %s1724_s19  ;;  %p1729_p8 = scmp.lt.u32.totalorder %s2197_s24, %s2277_s25 }
 0x5a8   : > { %p1730_p13 = scmp.lt.u32.totalorder %s1728_s20, %s1724_s19  ;;  %p1732_p10 = scmp.lt.u32.totalorder %s1724_s19, %s2197_s24 }
 0x5a9   : > { %p1726_p0 = pnand %p1725_p9, %p2008_p5 }
 0x5aa   : > { %p1731_p6 = por %p1730_p13, %p1729_p8 }
 0x5ab   : > { %p1727_p11 = pneg %p1726_p0 }
 0x5ac   : > { %p1733_p3 = por %p1732_p10, %p1731_p6 }
 0x5ae   : > { %p1734_p7 = pnand %p1733_p3, %p1727_p11 }
 0x5b0   : > { %1737 = shalt.err (!%p1734_p7)
}
 0x5b1   : > { %s1803_s28 = smov 128  }
 0x5b2   : > { %1480 = dma.vmem_to_hbm [thread:$0]  (%p2008_p5), %s2191_s26, 256, %s2197_s24, %s1197_s13, %s1803_s28, %s1803_s28, %s1799_s15  }
 0x5b3 PF: > { %s2278_s17 = sld [smem:[#allocation19_spill]]  ;;  %s2279_s18 = sld [smem:[#allocation20_spill]] }
 0x5b4   : > { %p2281_p1 = scmp.ge.s32.totalorder %s1784_s12, 2 }
 0x5b9   : > { %s1225_s23 = sand.u32 1, %s2278_s17   ;;  %p2280_p12 = scmp.ne.s32.totalorder %s2279_s18, 0 }
 0x5ba   : > { %s1226_s19 = scalar_lea.sflag [#allocation8], %s1225_s23 }
 0x5bb   : > { %p1497_p2 = pnand %p2281_p1, %p2280_p12 }
 0x5bd   : > { %1767 = dma.done.wait (!%p1497_p2), %s1226_s19, 256  }
 0x5be   : > { %1769 = vsyncadd (!%p1497_p2), %s1226_s19, 4294967040  ;;  %p24_p4 = scmp.ge.s32.totalorder %s1994_s14, 4   ;;  %s2282_s30 = smov %s1776_s10 }
 0x5bf   : > { %s2283_s10 = smov %s1780_s11  ;;  %s2284_s11 = smov %s2004_s16 }
 0x5c0   : > { %s2285_s12 = smov %s1994_s14  ;;  %26 = sbr.rel (!%p24_p4) target bundleno = 9 (0x9), region = 113 }
 0x5c7   :  { %1231 = vsyncpa [#allocation7], 1 }
 0x5c8   :  { %1233 = vsyncpa [#allocation7 + $0x1], 1 }
 0x5c9   :  { %1234 = vsyncpa [#allocation10], 1 }
 0x5ca   :  { %1235 = vsyncpa [#allocation13], 1 }
 0x5cb   :  { %1236 = vsyncpa [#allocation8], 1 }
 0x5cc   :  { %1238 = vsyncpa [#allocation8 + $0x1], 1 }

// kernel: tpu_custom_call.1
= control target key start
LH: loop header
LB: loop body
LE: loop exit
PB: predicated region body
PF: predicated region fallthrough
CT: control target
= control target key end

     0   :  { %s2243_s0 = inlined_call_operand.hbm [shape: f32[32,32], index: 0, kind: input, shape index: {}]   ;;  %s2244_s1 = inlined_call_operand.hbm [shape: bf16[32,32], index: 1, kind: input, shape index: {}]   ;;  %s2245_s2 = inlined_call_operand.vmem [shape: f32[1,32], index: 2, kind: input, shape index: {}]   ;;  %s2246_s3 = inlined_call_operand.hbm [shape: bf16[32,32], index: 3, kind: input, shape index: {}]   ;;  %s2247_s4 = inlined_call_operand.vmem [shape: f32[1,32], index: 4, kind: input, shape index: {}]   ;;  %s2248_s5 = inlined_call_operand.vmem [shape: bf16[32,32], index: 5, kind: input, shape index: {}]   ;;  %s2249_s6 = inlined_call_operand.vmem [shape: f32[1,32], index: 6, kind: input, shape index: {}]   ;;  %s2250_s7 = inlined_call_operand.hbm [shape: bf16[32,32], index: 7, kind: input, shape index: {}]   ;;  %s2251_s8 = inlined_call_operand.vmem [shape: f32[1,32], index: 8, kind: input, shape index: {}]   ;;  %s2252_s9 = inlined_call_operand.hbm [shape: f32[32,32], index: 9, kind: output, shape index: {}]  }
   0x1   :  { %2259 = sst [smem:[#allocation21_spill]] %s2252_s9 }
   0x2   :  { %14 = vsyncpa [#allocation7], 0 }
   0x3   :  { %16 = vsyncpa [#allocation7 + $0x1], 0 }
   0x4   :  { %17 = vsyncpa [#allocation10], 0 }
   0x5   :  { %18 = vsyncpa [#allocation13], 0 }
   0x6   :  { %19 = vsyncpa [#allocation8], 0 }
   0x7   :  { %21 = vsyncpa [#allocation8 + $0x1], 0  ;;  %s1854_s30 = smov 0   ;;  %s1856_s10 = smov 0  }
   0x8   :  { %s1858_s11 = smov 0   ;;  %s1860_s12 = smov 0  }
   0x9 LB: > { %2260 = sst [smem:[#allocation19_spill]] %s1772_s30  ;;  %s1875_s13 = sadd.s32 4294967295, %s1784_s12   ;;  %s1784_s12 = sphi %s1860_s12, %s2285_s12   ;;  %s1780_s11 = sphi %s1858_s11, %s2284_s11   ;;  %s1776_s10 = sphi %s1856_s10, %s2283_s10   ;;  %s1772_s30 = sphi %s1854_s30, %s2282_s30  }
   0xa   : > { %s1312_s14 = sadd.s32 4294967294, %s1784_s12   ;;  %p47_p0 = scmp.ne.s32.totalorder %s1776_s10, %s1772_s30 }
   0xb   : > { %p2253_p1 = scmp.eq.s32.totalorder %s1875_s13, 0  ;;  %p245_p3 = scmp.eq.s32.totalorder %s1312_s14, 1 }
   0xc   : > { %p1313_p5 = scmp.ge.s32.totalorder %s1784_s12, 1  ;;  %p252_p7 = scmp.lt.s32.totalorder %s1784_s12, 3 }
   0xd   : > { %p1884_p4 = por %p2253_p1, %p47_p0  ;;  %p1889_p6 = por %p245_p3, %p47_p0 }
   0xe   : > { %p1894_p8 = pnand %p1313_p5, %p252_p7  ;;  %s1786_s18 = smov [#allocation9]  }
   0xf   : > { %s2261_s15 = scalar_select %p1884_p4, 1, 0 }
  0x10   : > { %s2262_s16 = scalar_select %p1889_p6, 1, 0 }
  0x11   : > { %s2264_s17 = scalar_select %p1894_p8, 1, 0 }
  0x12   : > { %2263 = sst [smem:[#allocation20_spill]] %s2262_s16  ;;  %s264_s19 = sshll.u32 %s1786_s18, 4  ;;  %s1898_s19 = int_to_ptr.vmem [resolvable:$true] %s264_s19 }
  0x13   : > { %p1482_p9 = pneg %p1894_p8  ;;  %s1787_s21 = smov [#allocation11]  }
  0x14   : > { %s280_s22 = sshll.u32 %s1787_s21, 4  ;;  %s1788_s23 = smov [#allocation12]   ;;  %s1909_s22 = int_to_ptr.vmem [resolvable:$true] %s280_s22 }
  0x15   : > { %p1905_p11 = pnand %p1482_p9, %p2253_p1  ;;  %s1911_s24 = sshll.u32 %s1788_s23, 4  ;;  %s303_s24 = int_to_ptr.vmem [resolvable:$true] %s1911_s24 }
  0x16   : > { %s1596_s27 = scalar_lea.hbm %s2244_s1, 256 }
  0x17   : > { %p1597_p12 = scmp.ne.s32.totalorder %s2244_s1, %s1596_s27  ;;  %p1921_p13 = pneg %p1905_p11 }
  0x18   : > { %p1603_p5 = scmp.lt.u32.totalorder %s1596_s27, %s2244_s1 }
  0x19   : > { %p1599_p0 = pnand %p1921_p13, %p1597_p12 }
  0x1b   : > { %p1600_p3 = pneg %p1599_p0 }
  0x1d   : > { %p1605_p7 = pnand %p1603_p5, %p1600_p3 }
  0x1f   : > { %1608 = shalt.err (!%p1605_p7)
}
  0x20   : > { %s1609_s23 = scalar_lea.vmem %s1898_s19, 256  ;;  %p1617_p2 = scmp.lt.s32.totalorder %s1898_s19, %s1898_s19 }
  0x21   : > { %p1610_p9 = scmp.ne.s32.totalorder %s1898_s19, %s1609_s23  ;;  %p1618_p6 = scmp.lt.s32.totalorder %s1609_s23, %s1609_s23 }
  0x23   : > { %p1612_p10 = pnand %p1610_p9, %p1921_p13  ;;  %p1619_p12 = por %p1618_p6, %p1617_p2 }
  0x25   : > { %p1613_p1 = pneg %p1612_p10 }
  0x27   : > { %p1620_p0 = pnand %p1619_p12, %p1613_p1 }
  0x29   : > { %1623 = shalt.err (!%p1620_p0)
}
  0x2a   : > { %s1789_s25 = smov 64   ;;  %s1790_s26 = smov 4  }
  0x2b   : > { %1485 = dma.hbm_to_vmem [thread:$0]  (!%p1905_p11), %s2244_s1, 256, %s1898_s19, [#allocation10], %s1789_s25, %s1789_s25, %s1790_s26  }
  0x2c   : > { %s1624_s21 = scalar_lea.hbm %s2246_s3, 256 }
  0x2d   : > { %p1625_p1 = scmp.ne.s32.totalorder %s2246_s3, %s1624_s21  ;;  %p1631_p10 = scmp.lt.u32.totalorder %s1624_s21, %s2246_s3 }
  0x2f   : > { %p1627_p2 = pnand %p1625_p1, %p1921_p13 }
  0x31   : > { %p1628_p6 = pneg %p1627_p2 }
  0x33   : > { %p1633_p3 = pnand %p1631_p10, %p1628_p6 }
  0x35   : > { %1636 = shalt.err (!%p1633_p3)
}
  0x36   : > { %s1637_s19 = scalar_lea.vmem %s1909_s22, 256  ;;  %p1645_p12 = scmp.lt.s32.totalorder %s1909_s22, %s1909_s22 }
  0x37   : > { %p1638_p5 = scmp.ne.s32.totalorder %s1909_s22, %s1637_s19  ;;  %p1646_p0 = scmp.lt.s32.totalorder %s1637_s19, %s1637_s19 }
  0x39   : > { %p1640_p7 = pnand %p1638_p5, %p1921_p13  ;;  %p1647_p1 = por %p1646_p0, %p1645_p12 }
  0x3b   : > { %p1641_p9 = pneg %p1640_p7 }
  0x3d   : > { %p1648_p2 = pnand %p1647_p1, %p1641_p9 }
  0x3f   : > { %1651 = shalt.err (!%p1648_p2)
}
  0x40   : > { %1488 = dma.hbm_to_vmem [thread:$0]  (!%p1905_p11), %s2246_s3, 256, %s1909_s22, [#allocation10], %s1789_s25, %s1789_s25, %s1790_s26  }
  0x41   : > { %s1652_s28 = scalar_lea.hbm %s2250_s7, 256 }
  0x42   : > { %p1653_p6 = scmp.ne.s32.totalorder %s2250_s7, %s1652_s28  ;;  %p1659_p5 = scmp.lt.u32.totalorder %s1652_s28, %s2250_s7 }
  0x44   : > { %p1655_p10 = pnand %p1653_p6, %p1921_p13 }
  0x46   : > { %p1656_p3 = pneg %p1655_p10 }
  0x48   : > { %p1661_p7 = pnand %p1659_p5, %p1656_p3 }
  0x4a   : > { %1664 = shalt.err (!%p1661_p7)
}
  0x4b   : > { %s1665_s19 = scalar_lea.vmem %s303_s24, 256  ;;  %p1673_p1 = scmp.lt.s32.totalorder %s303_s24, %s303_s24 }
  0x4c   : > { %p1666_p9 = scmp.ne.s32.totalorder %s303_s24, %s1665_s19  ;;  %p1674_p2 = scmp.lt.s32.totalorder %s1665_s19, %s1665_s19 }
  0x4e   : > { %p1668_p12 = pnand %p1666_p9, %p1921_p13  ;;  %p1675_p4 = por %p1674_p2, %p1673_p1 }
  0x50   : > { %p1669_p0 = pneg %p1668_p12 }
  0x52   : > { %p1676_p8 = pnand %p1675_p4, %p1669_p0 }
  0x54   : > { %1679 = shalt.err (!%p1676_p8)
}
  0x55   : > { %1491 = dma.hbm_to_vmem [thread:$0]  (!%p1905_p11), %s2250_s7, 256, %s303_s24, [#allocation13], %s1789_s25, %s1789_s25, %s1790_s26  }
  0x56   : > { %s1994_s14 = sadd.s32 1, %s1784_s12   ;;  %s34_s30 = sadd.s32 1, %s1780_s11 }
  0x57   : > { %s31_s20 = ssub.s32 %s1784_s12, %s1994_s14  ;;  %p41_p8 = scmp.ne.s32.totalorder %s1780_s11, %s1776_s10 }
  0x58   : > { %p32_p4 = scmp.eq.s32.totalorder %s31_s20, 0  ;;  %p42_p13 = scmp.eq.s32.totalorder %s1784_s12, 0 }
  0x59   : > { %p1503_p6 = scmp.lt.s32.totalorder %s1784_s12, 2  ;;  %p2267_p3 = scmp.eq.s32.totalorder %s1875_s13, 1 }
  0x5a   : > { %s2004_s16 = scalar_select %p32_p4, %s1780_s11, %s34_s30  }
  0x5b   : > { %p43_p10 = por %p42_p13, %p41_p8  ;;  %p2008_p5 = por %p2267_p3, %p41_p8 }
  0x5c   : > { %s319_s28 = sand.u32 1, %s1780_s11   ;;  %s1356_s29 = sshll.u32 %s1784_s12, 8 }
  0x5d   : > { %s1318_s24 = sshll.u32 %s319_s28, 4  ;;  %s2017_s18 = scalar_lea.hbm %s2243_s0, %s1356_s29 }
  0x5e   : > { %s323_s21 = scalar_lea.vmem [#allocation6], %s1318_s24  ;;  %p2019_p11 = pnand %p1503_p6, %p43_p10 }
  0x5f   : > { %s330_s23 = sshll.u32 %s323_s21, 4  ;;  %s2025_s22 = scalar_lea.sflag [#allocation7], %s319_s28  ;;  %s2023_s23 = int_to_ptr.vmem [resolvable:$true] %s330_s23 }
  0x60   : > { %s1680_s9 = scalar_lea.hbm %s2017_s18, 256  ;;  %p1682_p9 = pneg %p2019_p11 }
  0x61   : > { %p1681_p7 = scmp.ne.s32.totalorder %s2017_s18, %s1680_s9  ;;  %s1685_s29 = scalar_lea.hbm %s2243_s0, 512 }
  0x62   : > { %p1686_p1 = scmp.lt.u32.totalorder %s2017_s18, %s2243_s0  ;;  %p1687_p2 = scmp.lt.u32.totalorder %s1685_s29, %s1680_s9 }
  0x63   : > { %p1683_p12 = pnand %p1682_p9, %p1681_p7  ;;  %p1689_p8 = scmp.lt.u32.totalorder %s1680_s9, %s2017_s18 }
  0x64   : > { %p1688_p4 = por %p1687_p2, %p1686_p1 }
  0x65   : > { %p1684_p0 = pneg %p1683_p12 }
  0x66   : > { %p1690_p13 = por %p1689_p8, %p1688_p4 }
  0x68   : > { %p1691_p6 = pnand %p1690_p13, %p1684_p0 }
  0x6a   : > { %1694 = shalt.err (!%p1691_p6)
}
  0x6b   : > { %s1695_s28 = scalar_lea.vmem %s2023_s23, 256  ;;  %s1791_s26 = smov [#allocation6]  }
  0x6c   : > { %p1696_p10 = scmp.ne.s32.totalorder %s2023_s23, %s1695_s28  ;;  %s1700_s21 = sshll.u32 %s1791_s26, 4  ;;  %s1701_s21 = int_to_ptr.vmem [resolvable:$false] %s1700_s21 }
  0x6d   : > { %s1702_s20 = scalar_lea.vmem %s1701_s21, 512  ;;  %p1703_p12 = scmp.lt.s32.totalorder %s2023_s23, %s1701_s21 }
  0x6e   : > { %p1698_p3 = pnand %p1696_p10, %p1682_p9  ;;  %p1704_p1 = scmp.lt.s32.totalorder %s1702_s20, %s1695_s28 }
  0x70   : > { %p1699_p7 = pneg %p1698_p3  ;;  %p1705_p2 = por %p1704_p1, %p1703_p12 }
  0x72   : > { %p1706_p4 = pnand %p1705_p2, %p1699_p7 }
  0x74   : > { %1709 = shalt.err (!%p1706_p4)
}
  0x75   : > { %s1792_s9 = smov 128   ;;  %s1793_s30 = smov 8  }
  0x76   : > { %1495 = dma.hbm_to_vmem [thread:$0]  (!%p2019_p11), %s2017_s18, 256, %s2023_s23, %s2025_s22, %s1792_s9, %s1792_s9, %s1793_s30  }
  0x77   : > { %p2270_p9 = scmp.ne.s32.totalorder %s2264_s17, 0 }
  0x78   : > { %s2056_s29 = sand.u32 (!%p2270_p9), 1, %s1776_s10   ;;  %p2271_p0 = scmp.ne.s32.totalorder (!%p2270_p9), %s2261_s15, 0 }
  0x79   : > { %342 = sbr.rel (%p2270_p9) target bundleno = 1459 (0x5b3), region = 56  ;;  %s1322_s24 = sshll.u32 (!%p2270_p9), %s2056_s29, 4 }
  0x7a   : > { %s345_s25 = scalar_lea.sflag (!%p2270_p9), [#allocation7], %s2056_s29  ;;  %s348_s28 = scalar_lea.vmem (!%p2270_p9), [#allocation6], %s1322_s24 }
  0x80   : > { %1755 = dma.done.wait (%p2271_p0), %s345_s25, 256  }
  0x81   : > { %1757 = vsyncadd (%p2271_p0), %s345_s25, 4294967040  ;;  %p2272_p11 = scmp.eq.s32.totalorder %s1875_s13, 0 }
  0x83   : > { %1759 = dma.done.wait (%p2272_p11), [#allocation10], 512   ;;  %p2273_p8 = pmov %p2272_p11 }
  0x85   : > { %1761 = vsyncadd (%p2273_p8), [#allocation10], 4294966784  ;;  %p2274_p13 = pmov %p2273_p8 }
  0x86   : > { %p2275_p6 = pmov %p2273_p8 }
  0x87   : > { %1763 = dma.done.wait (%p2274_p13), [#allocation13], 256  }
  0x88   : > { %1765 = vsyncadd (%p2275_p6), [#allocation13], 4294967040  ;;  %v1794_v0 = vmov 0.0   ;;  %vm1795_vm0 = vmmov 0   ;;  %v1556_v1 = vld [vmem:[#allocation11] sm:$0xff]   ;;  %v1557_v2 = vld [vmem:[#allocation9] sm:$0xff]  }
  0x89   : > { %1394 = vmatprep.subr.bf16.mxu1 %v1794_v0  ;;  %1386 = vmatprep.subr.bf16.mxu0 %v1794_v0  ;;  %v1558_v3 = vld [vmem:[#allocation11 + $0x8] sm:$0xff]   ;;  %v398_v4 = vld [vmem:[%s348_s28] sm:$0xff]  ;;  %vm424_vm1 = vcmask 261120   ;;  %v1559_v6 = vld [vmem:[#allocation9 + $0x8] sm:$0xff]   ;;  %vm606_vm2 = vcmask 64512   ;;  %s1796_s20 = smov 112  }
  0x8a   : > { %1398 = vmatprep.mubr.msk.bf16.mxu1 %vm1795_vm0, %v1794_v0  ;;  %1390 = vmatprep.mubr.msk.bf16.mxu0 %vm1795_vm0, %v1794_v0  ;;  %v399_v5 = vld [vmem:[%s348_s28 + $0x8] sm:$0xff]  ;;  %v1560_v8 = vld [vmem:[%s2248_s5] sm:$0xff]   ;;  %s1797_s9 = smov 120   ;;  %s1798_s30 = smov 104   ;;  %vm654_vm3 = vcmask 130048   ;;  %vm856_vm4 = vcmask 130112  }
  0x8b   : > { %1395 = vmatpush3.bf16.msra.mxu1 %v1556_v1  ;;  %1387 = vmatpush3.bf16.msra.mxu0 %v1557_v2  ;;  %v400_v7 = vpack.c.bf16 %v399_v5, %v398_v4  ;;  %v1561_v9 = vld [vmem:[%s2248_s5 + $0x8] sm:$0xff]   ;;  %v1327_v10 = vld [vmem:[%s2245_s2] ss:$0 sm:$0xff]  ;;  %s1799_s15 = smov 8   ;;  %s1800_s17 = smov 16   ;;  %vm990_vm5 = vcmask 195712  }
  0x8c   : > { %1396 = vmatprep.subr.bf16.mxu1 %v1794_v0  ;;  %1388 = vmatprep.subr.bf16.mxu0 %v1794_v0  ;;  %v1331_v11 = vld [vmem:[%s2247_s4] ss:$0 sm:$0xff]  ;;  %s1801_s18 = smov 24   ;;  %vm1124_vm6 = vcmask 261312   ;;  %s394_s22 = scalar_lea.vmem [#allocation14], %s1322_s24 }
  0x8d   : > { %v1335_v29 = vld [vmem:[%s2249_s6] ss:$0 sm:$0xff]  ;;  %s1210_s26 = sshll.u32 %s394_s22, 4  ;;  %s1357_s21 = sshll.u32 %s1875_s13, 8  ;;  %s2191_s26 = int_to_ptr.vmem [resolvable:$true] %s1210_s26 }
  0x8e   : > { %s1197_s13 = scalar_lea.sflag [#allocation8], %s2056_s29  ;;  %s1710_s28 = scalar_lea.vmem %s2191_s26, 256 }
  0x8f   : > { %1397 = vmatpush3.bf16.msra.mxu1 %v1558_v3  ;;  %1389 = vmatpush3.bf16.msra.mxu0 %v1559_v6  ;;  %p1711_p10 = scmp.ne.s32.totalorder %s2191_s26, %s1710_s28 }
  0x90   : > { %1410 = vmatprep.subr.bf16.mxu1 %v1794_v0  ;;  %1402 = vmatprep.subr.bf16.mxu0 %v1794_v0 }
  0x91   : > { %p1712_p3 = pnand %p1711_p10, %p2008_p5 }
  0x92   : > { %1399 = vmatmul.mubr.msk.bf16.vlgmr.msra.gmra.mrb[0].mxu1 %vm424_vm1, %v400_v7  ;;  %1391 = vmatmul.mubr.msk.bf16.vlgmr.msra.gmra.mrb[0].mxu0 %vm424_vm1, %v400_v7 }
  0x93   : > { %1412 = vmatprep.mubr.msk.bf16.mxu1 %vm1795_vm0, %v1794_v0  ;;  %1406 = vmatprep.mubr.msk.bf16.mxu0 %vm1795_vm0, %v1794_v0  ;;  %p1713_p7 = pneg %p1712_p3 }
  0x94   : > { %1403 = vmatpush3.bf16.msra.mxu0 %v1560_v8 }
  0x95   : > { %1404 = vmatprep.subr.bf16.mxu0 %v1794_v0 }
  0x98   : > { %1405 = vmatpush3.bf16.msra.mxu0 %v1561_v9 }
  0x99   : > { %1416 = vmatprep.subr.bf16.mxu0 %v1794_v0 }
  0x9b   : > { %1407 = vmatmul.mubr.msk.bf16.vlgmr.msra.gmra.mrb[4].mxu0 %vm424_vm1, %v400_v7 }
  0x9c   : > { %1418 = vmatprep.mubr.msk.bf16.mxu0 %vm1795_vm0, %v1794_v0 }
 0x165   : > { %v528_v12 = vpop.f32.mrb[0].mxu1  ;;  %v462_v14 = vpop.f32.mrb[0].mxu0 }
 0x166   : > { %v1400_v13 = vpop.f32.mrb[1].mxu1  ;;  %v463_v16 = vadd.f32 %v1327_v10, %v462_v14  ;;  %v1392_v17 = vpop.f32.mrb[1].mxu0  ;;  %v529_v18 = vadd.f32 %v1331_v11, %v528_v12 }
 0x167   : > { %v531_v15 = vpop.f32.mrb[2].mxu1  ;;  %v465_v21 = vpop.f32.mrb[2].mxu0 }
 0x168   : > { %v532_v19 = vadd.f32 %v1331_v11, %v531_v15  ;;  %v1401_v20 = vpop.f32.mrb[3].mxu1  ;;  %v466_v22 = vadd.f32 %v1327_v10, %v465_v21  ;;  %v1393_v23 = vpop.f32.mrb[3].mxu0 }
 0x16a   : > { %v535_v24 = vpack.c.bf16 %v532_v19, %v529_v18  ;;  %v469_v25 = vpack.c.bf16 %v466_v22, %v463_v16 }
 0x16c   : > { %536 = vst.msk [vmem:[#allocation3] sm:$0xff] %vm424_vm1, %v535_v24  ;;  %470 = vst.msk [vmem:[#allocation2] sm:$0xff] %vm424_vm1, %v469_v25 }
 0x16e   : > { %v594_v30 = vpop.f32.mrb[4].mxu0 }
 0x16f   : > { %v595_v31 = vadd.f32 %v1335_v29, %v594_v30  ;;  %v1408_v32 = vpop.f32.mrb[5].mxu0 }
 0x170   : > { %v597_v33 = vpop.f32.mrb[6].mxu0 }
 0x171   : > { %v598_v34 = vadd.f32 %v1335_v29, %v597_v33  ;;  %v1409_v35 = vpop.f32.mrb[7].mxu0 }
 0x173   : > { %v859_v26 = vld [vmem:[#allocation3] sm:$0xff]  ;;  %v858_v28 = vld [vmem:[#allocation2] sm:$0xff]  ;;  %v601_v36 = vpack.c.bf16 %v598_v34, %v595_v31 }
 0x174   : > { %865 = vrot.lane.b32.xlu1 %v859_v26, %s1796_s20  ;;  %731 = vrot.lane.b32.xlu0 %v859_v26, %s1797_s9  ;;  %v611_v27 = vsel %vm606_vm2, %v859_v26, 0 }
 0x175   : > { %1411 = vmatpush3.bf16.xpose.msra.mxu1 %v611_v27  ;;  %602 = vst.msk [vmem:[#allocation4] sm:$0xff] %vm424_vm1, %v601_v36 }
 0x176   : > { %1422 = vmatprep.subr.bf16.mxu1 %v1794_v0 }
 0x178   : > { %862 = vrot.lane.b32.xlu1 %v858_v28, %s1796_s20  ;;  %728 = vrot.lane.b32.xlu0 %v858_v28, %s1797_s9 }
 0x17c   : > { %996 = vrot.lane.b32.xlu1 %v858_v28, %s1798_s30  ;;  %999 = vrot.lane.b32.xlu0 %v859_v26, %s1798_s30  ;;  %v2125_v39 = vld [vmem:[#allocation4] sm:$0xff] }
 0x17d   : > { %1413 = vmatmul.mubr.msk.bf16.vlgmr.msra.gmra.mrb[4].mxu1 %vm606_vm2, %v858_v28  ;;  %1417 = vmatpush3.bf16.msra.mxu0 %v2125_v39 }
 0x17e   : > { %1424 = vmatprep.mubr.msk.bf16.mxu1 %vm1795_vm0, %v1794_v0  ;;  %1428 = vmatprep.subr.bf16.mxu0 %v1794_v0 }
 0x1e6   : > { %v732_v37 = vpop.permute.xlu0 %731  ;;  %v866_v40 = vpop.permute.xlu1 %865 }
 0x1e7   : > { %v737_v38 = vsel %vm606_vm2, %v732_v37, 0  ;;  %v871_v42 = vsel %vm606_vm2, %v866_v40, 0 }
 0x1e8   : > { %1423 = vmatpush3.bf16.xpose.msra.mxu1 %v737_v38 }
 0x1e9   : > { %1434 = vmatprep.subr.bf16.mxu1 %v1794_v0 }
 0x1ea   : > { %v729_v41 = vpop.permute.xlu0 %728  ;;  %v863_v44 = vpop.permute.xlu1 %862 }
 0x1ee   : > { %v1000_v43 = vpop.permute.xlu0 %999  ;;  %v997_v46 = vpop.permute.xlu1 %996 }
 0x1ef   : > { %1425 = vmatmul.mubr.msk.bf16.vlgmr.msra.gmra.mrb[8].mxu1 %vm606_vm2, %v729_v41  ;;  %v1005_v45 = vsel %vm606_vm2, %v1000_v43, 0 }
 0x1f0   : > { %1435 = vmatpush3.bf16.xpose.msra.mxu1 %v871_v42  ;;  %1436 = vmatprep.mubr.msk.bf16.mxu1 %vm1795_vm0, %v1794_v0 }
 0x1f1   : > { %1446 = vmatprep.subr.bf16.mxu1 %v1794_v0 }
 0x1f7   : > { %1437 = vmatmul.mubr.msk.bf16.vlgmr.msra.gmra.mrb[12].mxu1 %vm606_vm2, %v863_v44 }
 0x1f8   : > { %1447 = vmatpush3.bf16.xpose.msra.mxu1 %v1005_v45  ;;  %1448 = vmatprep.mubr.msk.bf16.mxu1 %vm1795_vm0, %v1794_v0 }
 0x1f9   : > { %1458 = vmatprep.subr.bf16.mxu1 %v1794_v0 }
 0x1ff   : > { %1449 = vmatmul.mubr.msk.bf16.vlgmr.msra.gmra.mrb[16].mxu1 %vm606_vm2, %v997_v46 }
 0x200   : > { %1462 = vmatprep.mubr.msk.bf16.mxu1 %vm1795_vm0, %v1794_v0 }
 0x250   : > { %v647_v47 = vpop.f32.mrb[4].mxu1 }
 0x251   : > { %v1414_v48 = vpop.f32.mrb[5].mxu1  ;;  %v655_v49 = vsel %vm654_vm3, %v647_v47, -inf }
 0x252   : > { %656 = vmax.xlane.f32.xlu0 %v655_v49  ;;  %v650_v50 = vpop.f32.mrb[6].mxu1 }
 0x253   : > { %v1415_v51 = vpop.f32.mrb[7].mxu1  ;;  %v658_v52 = vsel %vm654_vm3, %v650_v50, -inf }
 0x254   : > { %659 = vmax.xlane.f32.xlu1 %v658_v52 }
 0x265   : > { %800 = vrot.lane.b32.xlu1 %v2125_v39, %s1797_s9 }
 0x2c2   : > { %v773_v53 = vpop.f32.mrb[8].mxu1 }
 0x2c3   : > { %v1426_v54 = vpop.f32.mrb[9].mxu1  ;;  %v780_v55 = vsel %vm654_vm3, %v773_v53, -inf }
 0x2c4   : > { %781 = vmax.xlane.f32.xlu0 %v780_v55  ;;  %v776_v56 = vpop.f32.mrb[10].mxu1 }
 0x2c5   : > { %v1427_v57 = vpop.f32.mrb[11].mxu1  ;;  %v783_v58 = vsel %vm654_vm3, %v776_v56, -inf }
 0x2c8   : > { %784 = vmax.xlane.f32.xlu0 %v783_v58 }
 0x2ca   : > { %v907_v59 = vpop.f32.mrb[12].mxu1 }
 0x2cb   : > { %v1438_v60 = vpop.f32.mrb[13].mxu1  ;;  %v914_v61 = vsel %vm654_vm3, %v907_v59, -inf }
 0x2cc   : > { %v910_v62 = vpop.f32.mrb[14].mxu1  ;;  %915 = vmax.xlane.f32.xlu1 %v914_v61 }
 0x2cd   : > { %v1439_v63 = vpop.f32.mrb[15].mxu1  ;;  %v917_v1 = vsel %vm654_vm3, %v910_v62, -inf }
 0x2ce   : > { %918 = vmax.xlane.f32.xlu0 %v917_v1 }
 0x2d2   : > { %v1041_v2 = vpop.f32.mrb[16].mxu1 }
 0x2d3   : > { %v1450_v3 = vpop.f32.mrb[17].mxu1  ;;  %v1048_v4 = vsel %vm654_vm3, %v1041_v2, -inf }
 0x2d4   : > { %v1044_v5 = vpop.f32.mrb[18].mxu1  ;;  %1049 = vmax.xlane.f32.xlu1 %v1048_v4 }
 0x2d5   : > { %v1451_v6 = vpop.f32.mrb[19].mxu1  ;;  %v1051_v7 = vsel %vm654_vm3, %v1044_v5, -inf }
 0x2d6   : > { %1052 = vmax.xlane.f32.xlu0 %v1051_v7 }
 0x2df   : > { %v657_v8 = vpop.xlane.xlu0 %656 }
 0x2e0   : > { %v661_v9 = vsub.f32 %v647_v47, %v657_v8 }
 0x2e1   : > { %v660_v10 = vpop.xlane.xlu1 %659 }
 0x2e2   : > { %v663_v11 = vmul.f32 1.442695, %v661_v9  ;;  %v662_v12 = vsub.f32 %v650_v50, %v660_v10 }
 0x2e4   : > { %v665_v13 = vmul.f32 1.442695, %v662_v12  ;;  %1564 = vpow2.f32 %v663_v11 }
 0x2e5   : > { %1068 = vrot.lane.b32.xlu1 %v2125_v39, %s1798_s30  ;;  %v801_v17 = vpop.permute.xlu1 %800  ;;  %s2276_s30 = sld [smem:[#allocation21_spill]] }
 0x2e6   : > { %1566 = vpow2.f32 %v665_v13 }
 0x2eb   : > { %s2277_s25 = smov %s2276_s30  ;;  %s2197_s24 = scalar_lea.hbm %s2276_s30, %s1357_s21 }
 0x2ec   : > { %934 = vrot.lane.b32.xlu0 %v2125_v39, %s1796_s20 }
 0x2ee   : > { %v1565_v14 = vpop.eup %1564 }
 0x2f0   : > { %v2157_v15 = vpop.eup %1566 }
 0x2f1   : > { %v673_v16 = vpack.c.bf16 %v2157_v15, %v1565_v14  ;;  %v670_v54 = vsel %vm654_vm3, %v2157_v15, 0.0 }
 0x2f3   : > { %1419 = vmatmul.mubr.msk.bf16.vlgmr.msra.gmra.mrb[8].mxu0 %vm654_vm3, %v673_v16 }
 0x2f4   : > { %1429 = vmatpush3.bf16.msra.mxu0 %v801_v17  ;;  %1430 = vmatprep.mubr.msk.bf16.mxu0 %vm1795_vm0, %v1794_v0 }
 0x2f5   : > { %1440 = vmatprep.subr.bf16.mxu0 %v1794_v0 }
 0x351   : > { %v782_v18 = vpop.xlane.xlu0 %781 }
 0x352   : > { %v786_v19 = vsub.f32 %v773_v53, %v782_v18  ;;  %v667_v53 = vsel %vm654_vm3, %v1565_v14, 0.0 }
 0x354   : > { %v788_v20 = vmul.f32 1.442695, %v786_v19 }
 0x355   : > { %v785_v21 = vpop.xlane.xlu0 %784 }
 0x356   : > { %1568 = vpow2.f32 %v788_v20  ;;  %v787_v22 = vsub.f32 %v776_v56, %v785_v21 }
 0x358   : > { %v790_v23 = vmul.f32 1.442695, %v787_v22 }
 0x359   : > { %v916_v24 = vpop.xlane.xlu1 %915 }
 0x35a   : > { %1570 = vpow2.f32 %v790_v23  ;;  %v920_v25 = vsub.f32 %v907_v59, %v916_v24  ;;  %v1562_v23 = vld [vmem:[#allocation12] sm:$0xff]  }
 0x35b   : > { %v919_v26 = vpop.xlane.xlu0 %918  ;;  %1459 = vmatpush3.bf16.msra.mxu1 %v1562_v23 }
 0x35c   : > { %v922_v27 = vmul.f32 1.442695, %v920_v25  ;;  %v921_v28 = vsub.f32 %v910_v62, %v919_v26  ;;  %1460 = vmatprep.subr.bf16.mxu1 %v1794_v0 }
 0x35e   : > { %1572 = vpow2.f32 %v922_v27  ;;  %v924_v29 = vmul.f32 1.442695, %v921_v28  ;;  %v1563_v27 = vld [vmem:[#allocation12 + $0x8] sm:$0xff]  }
 0x35f   : > { %1461 = vmatpush3.bf16.msra.mxu1 %v1563_v27 }
 0x360   : > { %v1569_v30 = vpop.eup %1568  ;;  %1574 = vpow2.f32 %v924_v29 }
 0x361   : > { %v1050_v31 = vpop.xlane.xlu1 %1049  ;;  %v792_v32 = vsel %vm654_vm3, %v1569_v30, 0.0 }
 0x362   : > { %v1054_v33 = vsub.f32 %v1041_v2, %v1050_v31  ;;  %793 = vadd.xlane.f32.xlu1 %v792_v32 }
 0x363   : > { %v1053_v34 = vpop.xlane.xlu0 %1052 }
 0x364   : > { %v1571_v35 = vpop.eup %1570  ;;  %v1056_v36 = vmul.f32 1.442695, %v1054_v33  ;;  %v1055_v37 = vsub.f32 %v1044_v5, %v1053_v34 }
 0x365   : > { %v795_v38 = vsel %vm654_vm3, %v1571_v35, 0.0  ;;  %v798_v39 = vpack.c.bf16 %v1571_v35, %v1569_v30  ;;  %v1069_v47 = vpop.permute.xlu1 %1068 }
 0x366   : > { %1576 = vpow2.f32 %v1056_v36  ;;  %v1058_v40 = vmul.f32 1.442695, %v1055_v37  ;;  %796 = vadd.xlane.f32.xlu0 %v795_v38 }
 0x367   : > { %v935_v41 = vpop.permute.xlu0 %934  ;;  %1431 = vmatmul.mubr.msk.bf16.vlgmr.msra.gmra.mrb[12].mxu0 %vm654_vm3, %v798_v39 }
 0x368   : > { %v1573_v42 = vpop.eup %1572  ;;  %1578 = vpow2.f32 %v1058_v40  ;;  %1441 = vmatpush3.bf16.msra.mxu0 %v935_v41  ;;  %1442 = vmatprep.mubr.msk.bf16.mxu0 %vm1795_vm0, %v1794_v0  ;;  %v1347_v41 = vld [vmem:[%s2251_s8] ss:$0 sm:$0xff] }
 0x369   : > { %v926_v43 = vsel %vm654_vm3, %v1573_v42, 0.0  ;;  %1452 = vmatprep.subr.bf16.mxu0 %v1794_v0 }
 0x36a   : > { %v1575_v44 = vpop.eup %1574  ;;  %927 = vadd.xlane.f32.xlu0 %v926_v43 }
 0x36b   : > { %v929_v45 = vsel %vm654_vm3, %v1575_v44, 0.0  ;;  %v932_v46 = vpack.c.bf16 %v1575_v44, %v1573_v42 }
 0x36c   : > { %930 = vadd.xlane.f32.xlu1 %v929_v45 }
 0x36f   : > { %1443 = vmatmul.mubr.msk.bf16.vlgmr.msra.gmra.mrb[16].mxu0 %vm654_vm3, %v932_v46 }
 0x370   : > { %v1577_v48 = vpop.eup %1576  ;;  %1453 = vmatpush3.bf16.msra.mxu0 %v1069_v47  ;;  %1454 = vmatprep.mubr.msk.bf16.mxu0 %vm1795_vm0, %v1794_v0 }
 0x371   : > { %v1060_v49 = vsel %vm654_vm3, %v1577_v48, 0.0 }
 0x372   : > { %v1579_v50 = vpop.eup %1578  ;;  %1061 = vadd.xlane.f32.xlu0 %v1060_v49 }
 0x373   : > { %v1063_v51 = vsel %vm654_vm3, %v1579_v50, 0.0  ;;  %v1066_v52 = vpack.c.bf16 %v1579_v50, %v1577_v48 }
 0x374   : > { %1064 = vadd.xlane.f32.xlu1 %v1063_v51 }
 0x376   : > { %668 = vadd.xlane.f32.xlu0 %v667_v53 }
 0x377   : > { %1455 = vmatmul.mubr.msk.bf16.vlgmr.msra.gmra.mrb[20].mxu0 %vm654_vm3, %v1066_v52 }
 0x378   : > { %671 = vadd.xlane.f32.xlu1 %v670_v54 }
 0x3c6   : > { %v711_v55 = vpop.f32.mrb[8].mxu0 }
 0x3c7   : > { %v1420_v56 = vpop.f32.mrb[9].mxu0 }
 0x3c8   : > { %v714_v57 = vpop.f32.mrb[10].mxu0 }
 0x3c9   : > { %v1421_v58 = vpop.f32.mrb[11].mxu0 }
 0x3ef   : > { %v794_v60 = vpop.xlane.xlu1 %793 }
 0x3f3   : > { %v797_v59 = vpop.xlane.xlu0 %796 }
 0x3f7   : > { %v928_v61 = vpop.xlane.xlu0 %927 }
 0x3f9   : > { %v931_v62 = vpop.xlane.xlu1 %930 }
 0x3ff   : > { %v1062_v63 = vpop.xlane.xlu0 %1061 }
 0x401   : > { %v1065_v1 = vpop.xlane.xlu1 %1064 }
 0x403   : > { %v669_v2 = vpop.xlane.xlu0 %668 }
 0x404   : > { %1580 = vrcp.f32 %v669_v2 }
 0x405   : > { %v672_v3 = vpop.xlane.xlu1 %671 }
 0x406   : > { %1582 = vrcp.f32 %v672_v3 }
 0x407   : > { %1584 = vrcp.f32 %v794_v60 }
 0x408   : > { %1586 = vrcp.f32 %v797_v59 }
 0x409   : > { %1588 = vrcp.f32 %v928_v61 }
 0x40a   : > { %1590 = vrcp.f32 %v931_v62 }
 0x40b   : > { %1592 = vrcp.f32 %v1062_v63 }
 0x40c   : > { %1594 = vrcp.f32 %v1065_v1 }
 0x40e   : > { %v1581_v4 = vpop.eup %1580 }
 0x40f   : > { %v720_v6 = vmul.f32 %v1581_v4, %v711_v55 }
 0x410   : > { %v1583_v5 = vpop.eup %1582 }
 0x411   : > { %v721_v7 = vmul.f32 %v1583_v5, %v714_v57  ;;  %v1585_v10 = vpop.eup %1584 }
 0x412   : > { %v1587_v12 = vpop.eup %1586 }
 0x413   : > { %v722_v8 = vpack.c.bf16 %v721_v7, %v720_v6  ;;  %v1589_v19 = vpop.eup %1588 }
 0x414   : > { %v1591_v21 = vpop.eup %1590 }
 0x415   : > { %723 = vst.msk [vmem:[#allocation5] sm:$0xff] %vm606_vm2, %v722_v8  ;;  %v1593_v29 = vpop.eup %1592 }
 0x416   : > { %v1595_v33 = vpop.eup %1594 }
 0x43a   : > { %v840_v9 = vpop.f32.mrb[12].mxu0 }
 0x43b   : > { %v1432_v11 = vpop.f32.mrb[13].mxu0  ;;  %v849_v14 = vmul.f32 %v1585_v10, %v840_v9 }
 0x43c   : > { %v843_v13 = vpop.f32.mrb[14].mxu0 }
 0x43d   : > { %v850_v15 = vmul.f32 %v1587_v12, %v843_v13  ;;  %v1433_v16 = vpop.f32.mrb[15].mxu0 }
 0x43f   : > { %v851_v17 = vpack.c.bf16 %v850_v15, %v849_v14 }
 0x441   : > { %853 = vrot.lane.b32.xlu0 %v851_v17, %s1799_s15 }
 0x442   : > { %v974_v18 = vpop.f32.mrb[16].mxu0 }
 0x443   : > { %v1444_v20 = vpop.f32.mrb[17].mxu0  ;;  %v983_v24 = vmul.f32 %v1589_v19, %v974_v18 }
 0x444   : > { %v977_v22 = vpop.f32.mrb[18].mxu0 }
 0x445   : > { %v984_v25 = vmul.f32 %v1591_v21, %v977_v22  ;;  %v1445_v26 = vpop.f32.mrb[19].mxu0 }
 0x447   : > { %v985_v28 = vpack.c.bf16 %v984_v25, %v983_v24 }
 0x449   : > { %987 = vrot.lane.b32.xlu1 %v985_v28, %s1800_s17  ;;  %s1802_s17 = smov [#allocation14]  }
 0x44a   : > { %v1108_v30 = vpop.f32.mrb[20].mxu0 }
 0x44b   : > { %v1117_v31 = vmul.f32 %v1593_v29, %v1108_v30  ;;  %v1456_v32 = vpop.f32.mrb[21].mxu0 }
 0x44c   : > { %v1111_v34 = vpop.f32.mrb[22].mxu0 }
 0x44d   : > { %v1118_v35 = vmul.f32 %v1595_v33, %v1111_v34  ;;  %v1457_v36 = vpop.f32.mrb[23].mxu0 }
 0x44f   : > { %v1119_v37 = vpack.c.bf16 %v1118_v35, %v1117_v31 }
 0x451   : > { %1121 = vrot.lane.b32.xlu1 %v1119_v37, %s1801_s18  ;;  %s1714_s18 = sshll.u32 %s1802_s17, 4  ;;  %s1715_s18 = int_to_ptr.vmem [resolvable:$false] %s1714_s18 }
 0x452   : > { %s1716_s23 = scalar_lea.vmem %s1715_s18, 512  ;;  %p1717_p12 = scmp.lt.s32.totalorder %s2191_s26, %s1715_s18 }
 0x453   : > { %p1718_p1 = scmp.lt.s32.totalorder %s1716_s23, %s1710_s28 }
 0x455   : > { %p1719_p2 = por %p1718_p1, %p1717_p12 }
 0x457   : > { %p1720_p4 = pnand %p1719_p2, %p1713_p7 }
 0x4b3   : > { %v854_v38 = vpop.permute.xlu0 %853 }
 0x4b4   : > { %857 = vst.msk [vmem:[#allocation5] sm:$0xff] %vm856_vm4, %v854_v38 }
 0x4bb   : > { %v988_v0 = vpop.permute.xlu1 %987 }
 0x4bc   : > { %991 = vst.msk [vmem:[#allocation5] sm:$0xff] %vm990_vm5, %v988_v0 }
 0x4c3   : > { %v1122_v39 = vpop.permute.xlu1 %1121 }
 0x4c4   : > { %1125 = vst.msk [vmem:[#allocation5] sm:$0xff] %vm1124_vm6, %v1122_v39 }
 0x4cb   : > { %v1126_v40 = vld [vmem:[#allocation5] sm:$0xff] }
 0x4cc   : > { %1463 = vmatmul.mubr.msk.bf16.vlgmr.msra.gmra.mrb[20].mxu1 %vm424_vm1, %v1126_v40 }
 0x59f   : > { %v1187_v42 = vpop.f32.mrb[20].mxu1 }
 0x5a0   : > { %v1188_v43 = vadd.f32 %v1347_v41, %v1187_v42  ;;  %v1464_v44 = vpop.f32.mrb[21].mxu1 }
 0x5a1   : > { %v1190_v45 = vpop.f32.mrb[22].mxu1 }
 0x5a2   : > { %1194 = vst.msk [vmem:[%s394_s22] sm:$0xff] %vm424_vm1, %v1188_v43  ;;  %v1191_v46 = vadd.f32 %v1347_v41, %v1190_v45  ;;  %v1465_v47 = vpop.f32.mrb[23].mxu1 }
 0x5a4   : > { %1195 = vst.msk [vmem:[%s394_s22 + $0x8] sm:$0xff] %vm424_vm1, %v1191_v46 }
 0x5a5   : > { %1723 = shalt.err (!%p1720_p4)
}
 0x5a6   : > { %s1724_s19 = scalar_lea.hbm %s2197_s24, 256  ;;  %s1728_s20 = scalar_lea.hbm %s2277_s25, 512 }
 0x5a7   : > { %p1725_p9 = scmp.ne.s32.totalorder %s2197_s24, %s1724_s19  ;;  %p1729_p8 = scmp.lt.u32.totalorder %s2197_s24, %s2277_s25 }
 0x5a8   : > { %p1730_p13 = scmp.lt.u32.totalorder %s1728_s20, %s1724_s19  ;;  %p1732_p10 = scmp.lt.u32.totalorder %s1724_s19, %s2197_s24 }
 0x5a9   : > { %p1726_p0 = pnand %p1725_p9, %p2008_p5 }
 0x5aa   : > { %p1731_p6 = por %p1730_p13, %p1729_p8 }
 0x5ab   : > { %p1727_p11 = pneg %p1726_p0 }
 0x5ac   : > { %p1733_p3 = por %p1732_p10, %p1731_p6 }
 0x5ae   : > { %p1734_p7 = pnand %p1733_p3, %p1727_p11 }
 0x5b0   : > { %1737 = shalt.err (!%p1734_p7)
}
 0x5b1   : > { %s1803_s28 = smov 128  }
 0x5b2   : > { %1480 = dma.vmem_to_hbm [thread:$0]  (%p2008_p5), %s2191_s26, 256, %s2197_s24, %s1197_s13, %s1803_s28, %s1803_s28, %s1799_s15  }
 0x5b3 PF: > { %s2278_s17 = sld [smem:[#allocation19_spill]]  ;;  %s2279_s18 = sld [smem:[#allocation20_spill]] }
 0x5b4   : > { %p2281_p1 = scmp.ge.s32.totalorder %s1784_s12, 2 }
 0x5b9   : > { %s1225_s23 = sand.u32 1, %s2278_s17   ;;  %p2280_p12 = scmp.ne.s32.totalorder %s2279_s18, 0 }
 0x5ba   : > { %s1226_s19 = scalar_lea.sflag [#allocation8], %s1225_s23 }
 0x5bb   : > { %p1497_p2 = pnand %p2281_p1, %p2280_p12 }
 0x5bd   : > { %1767 = dma.done.wait (!%p1497_p2), %s1226_s19, 256  }
 0x5be   : > { %1769 = vsyncadd (!%p1497_p2), %s1226_s19, 4294967040  ;;  %p24_p4 = scmp.ge.s32.totalorder %s1994_s14, 4   ;;  %s2282_s30 = smov %s1776_s10 }
 0x5bf   : > { %s2283_s10 = smov %s1780_s11  ;;  %s2284_s11 = smov %s2004_s16 }
 0x5c0   : > { %s2285_s12 = smov %s1994_s14  ;;  %26 = sbr.rel (!%p24_p4) target bundleno = 9 (0x9), region = 113 }
 0x5c7   :  { %1231 = vsyncpa [#allocation7], 1 }
 0x5c8   :  { %1233 = vsyncpa [#allocation7 + $0x1], 1 }
 0x5c9   :  { %1234 = vsyncpa [#allocation10], 1 }
 0x5ca   :  { %1235 = vsyncpa [#allocation13], 1 }
 0x5cb   :  { %1236 = vsyncpa [#allocation8], 1 }
 0x5cc   :  { %1238 = vsyncpa [#allocation8 + $0x1], 1 }

</bundles_post_ra>
